<compile_context>
chip_gen: v5e
topology: v5e:2x2
jax: 0.10.0
libtpu: 0.0.40
codegen_flags: <defaults>
</compile_context>

<pallas_src>
import jax
import jax.numpy as jnp
from jax.experimental import pallas as pl
from jax.experimental.pallas import tpu as pltpu

# ------------------------- problem sizes (small) ----------------------------
B, T = 2, 4          # batch, video length
C_IN = 4             # input channels
H = W = 16           # spatial
HW = H * W
C_F = 32             # backbone feature channels
NQ = 8               # number of object queries / latents
D = 32               # latent width
NC = 8               # num_classes + 1
NB = 4               # box params
OUT_LANES = 128      # lane-dense (padded) head output width


# ------------------------------ Pallas kernel -------------------------------
def _rvom_kernel(x_ref,                 # (B*T, C_IN, HW)  NCHW-native, fp32
                 wbb_ref, bbb_ref,      # backbone 1x1 conv (C_IN, C_F, 1), (1, C_F, 1)
                 wx_ref, wh_ref, br_ref,  # recurrent cell (C_F, D), (D, D), (1, D)
                 wcat_ref, bcat_ref,    # fused heads, lane-padded (D, 128), (1, 128)
                 out_ref):              # (T*B*NQ, 128)
    # ---- backbone: 1x1 conv + ReLU for ALL B*T frames at once --------------
    # HW = 256 sits on the lane axis (dense vregs); the C_IN = 4 contraction
    # is 4 broadcasted VPU multiply-adds (no degenerate-K MXU matmul).
    x = x_ref[...]                                            # (B*T, C_IN, HW)
    wbb = wbb_ref[...]                                        # (C_IN, C_F, 1)
    feat = jnp.broadcast_to(bbb_ref[...], (B * T, C_F, HW))   # bias, hoisted
    for c in range(C_IN):                                     # static unroll
        feat = feat + wbb[c] * x[:, c, :][:, None, :]         # (B*T, C_F, HW)
    feat = jnp.maximum(feat, 0.0)                             # ReLU

    # ---- spatial mean pool (lane-axis reduction) ----------------------------
    pooled = jnp.mean(feat, axis=2)                           # (B*T, C_F)

    # ---- recurrence drive for every frame in one MXU matmul ----------------
    # xin[b*T + t] = pooled[b, t] @ wx + br; hoisted out of the time loop.
    xin = jnp.dot(pooled, wx_ref[...],
                  preferred_element_type=jnp.float32) + br_ref[...]   # (B*T, D)
    xin3 = xin.reshape(B, T, D)                               # frame f = b*T + t

    # ---- truly sequential part: latent recurrence over T -------------------
    # hs batched over all B*NQ rows; T is small & static -> fully unrolled.
    wh = wh_ref[...]

    def drive(t):
        xt = xin3[:, t, :]                                    # (B, D), static slice
        return jnp.broadcast_to(xt[:, None, :], (B, NQ, D)).reshape(B * NQ, D)

    hs = jnp.tanh(drive(0))             # hs_0 = 0  =>  hs_0 @ wh == 0
    hs_steps = [hs]
    for t in range(1, T):
        hs = jnp.tanh(jnp.dot(hs, wh, preferred_element_type=jnp.float32)
                      + drive(t))
        hs_steps.append(hs)
    hs_all = jnp.concatenate(hs_steps, axis=0)        # (T*B*NQ, D), (t, b, q)

    # ---- fused detection head: one matmul + ONE unmasked lane-dense store --
    z = jnp.dot(hs_all, wcat_ref[...],
                preferred_element_type=jnp.float32) + bcat_ref[...]  # (T*B*NQ, 128)
    lane = jax.lax.broadcasted_iota(jnp.int32, z.shape, 1)
    out_ref[...] = jnp.where(lane < NC, z, jax.nn.sigmoid(z)).astype(out_ref.dtype)


def rvom_forward(samples, params):
    """samples: (B, T, C_IN, H, W) float32 (PyTorch NCHW-per-frame layout)."""
    # Pure reshape (no transpose): NCHW-native (B*T, C_IN, HW).
    x3 = samples.reshape(B * T, C_IN, HW)

    # Weight layout glue (one-time, host-side, tiny).  Heads are fused and
    # zero-padded to 128 lanes so the kernel's output store is unmasked.
    wbb3 = params["wbb"].reshape(C_IN, C_F, 1)
    bbb3 = params["bbb"].reshape(1, C_F, 1)
    wcat = jnp.zeros((D, OUT_LANES), jnp.float32)
    wcat = wcat.at[:, :NC].set(params["wc"]).at[:, NC:NC + NB].set(params["wb"])
    bcat = jnp.zeros((1, OUT_LANES), jnp.float32)
    bcat = bcat.at[:, :NC].set(params["bc"]).at[:, NC:NC + NB].set(params["bb"])

    out = pl.pallas_call(
        _rvom_kernel,
        out_shape=jax.ShapeDtypeStruct((T * B * NQ, OUT_LANES), jnp.float32),
        grid=(1,),
        in_specs=[
            pl.BlockSpec((B * T, C_IN, HW), lambda i: (0, 0, 0)),
            pl.BlockSpec((C_IN, C_F, 1), lambda i: (0, 0, 0)),
            pl.BlockSpec((1, C_F, 1), lambda i: (0, 0, 0)),
            pl.BlockSpec((C_F, D), lambda i: (0, 0)),
            pl.BlockSpec((D, D), lambda i: (0, 0)),
            pl.BlockSpec((1, D), lambda i: (0, 0)),
            pl.BlockSpec((D, OUT_LANES), lambda i: (0, 0)),
            pl.BlockSpec((1, OUT_LANES), lambda i: (0, 0)),
        ],
        out_specs=pl.BlockSpec((T * B * NQ, OUT_LANES), lambda i: (0, 0)),
        compiler_params=pltpu.CompilerParams(
            dimension_semantics=("arbitrary",)),
    )(x3, wbb3, bbb3, params["wx"], params["wh"], params["br"], wcat, bcat)

    # Slice the real class/box lanes off the padded lane-dense slab; row order
    # already matches the PyTorch stack order (index = t * B + b).
    result = {
        "pred_logits": out[:, :NC].reshape(T * B, NQ, NC),
        "pred_boxes": out[:, NC:NC + NB].reshape(T * B, NQ, NB),
    }
    return result


def rvom_module(samples, targets):
    assert len(targets) == 1
    targets = targets[0]
    result = rvom_forward(samples, PARAMS)
    return result, targets


# ------------------------------ reference (pure JAX) -------------------------
def rvom_reference(samples, p):
    x = jnp.transpose(samples, (0, 1, 3, 4, 2)).reshape(B, T, HW, C_IN)
    hs = jnp.zeros((B, NQ, D), jnp.float32)
    logits_all, boxes_all = [], []
    for t in range(T):
        feat = jnp.maximum(x[:, t] @ p["wbb"] + p["bbb"], 0.0)       # (B, HW, C_F)
        pooled = feat.mean(axis=1, keepdims=True)                    # (B, 1, C_F)
        hs = jnp.tanh(hs @ p["wh"] + pooled @ p["wx"] + p["br"])     # (B, NQ, D)
        logits_all.append(hs @ p["wc"] + p["bc"])                    # extend over batch
        boxes_all.append(jax.nn.sigmoid(hs @ p["wb"] + p["bb"]))
    return (jnp.concatenate(logits_all, axis=0),
            jnp.concatenate(boxes_all, axis=0))


# ------------------------------ params -------------------------------------
def _init_params(key):
    ks = jax.random.split(key, 8)
    s = 0.1
    return {
        "wbb": s * jax.random.normal(ks[0], (C_IN, C_F), jnp.float32),
        "bbb": jnp.zeros((1, C_F), jnp.float32),
        "wx": s * jax.random.normal(ks[1], (C_F, D), jnp.float32),
        "wh": s * jax.random.normal(ks[2], (D, D), jnp.float32),
        "br": 0.01 * jax.random.normal(ks[3], (1, D), jnp.float32),
        "wc": s * jax.random.normal(ks[4], (D, NC), jnp.float32),
        "bc": jnp.zeros((1, NC), jnp.float32),
        "wb": s * jax.random.normal(ks[5], (D, NB), jnp.float32),
        "bb": jnp.zeros((1, NB), jnp.float32),
    }


PARAMS = _init_params(jax.random.PRNGKey(42))


if __name__ == "__main__":
    key = jax.random.PRNGKey(0)
    samples = jax.random.normal(key, (B, T, C_IN, H, W), jnp.float32)
    targets = [{"labels": jnp.zeros((B, NQ), jnp.int32),
                "boxes": jnp.zeros((B, NQ, 4), jnp.float32)}]

    (result, tgt) = rvom_module(samples, targets)
    jax.block_until_ready(result["pred_logits"])
    jax.block_until_ready(result["pred_boxes"])

    ref_logits, ref_boxes = rvom_reference(samples, PARAMS)
    assert result["pred_logits"].shape == (T * B, NQ, NC)
    assert result["pred_boxes"].shape == (T * B, NQ, NB)
    assert jnp.allclose(result["pred_logits"], ref_logits, atol=2e-5, rtol=2e-5)
    assert jnp.allclose(result["pred_boxes"], ref_boxes, atol=2e-5, rtol=2e-5)

    print("KERNEL_OK")
</pallas_src>

<mosaic_0001>
module attributes {stable_mosaic.version = 11 : i64} {
  func.func @_rvom_kernel(%arg0: i32, %arg1: memref<8x4x256xf32, #tpu.memory_space<vmem>>, %arg2: memref<4x32x1xf32, #tpu.memory_space<vmem>>, %arg3: memref<1x32x1xf32, #tpu.memory_space<vmem>>, %arg4: memref<32x32xf32, #tpu.memory_space<vmem>>, %arg5: memref<32x32xf32, #tpu.memory_space<vmem>>, %arg6: memref<1x32xf32, #tpu.memory_space<vmem>>, %arg7: memref<32x128xf32, #tpu.memory_space<vmem>>, %arg8: memref<1x128xf32, #tpu.memory_space<vmem>>, %arg9: memref<64x128xf32, #tpu.memory_space<vmem>>) attributes {dimension_semantics = [#tpu.dimension_semantics<arbitrary>], iteration_bounds = array<i64: 1>, scalar_prefetch = 0 : i64, scratch_operands = 0 : i64, tpu.core_type = #tpu.core_type<tc>, window_params = [{pipeline_mode = #tpu.pipeline_mode<synchronous>, transform_indices = @transform_0, window_bounds = array<i64: 8, 4, 256>}, {pipeline_mode = #tpu.pipeline_mode<synchronous>, transform_indices = @transform_1, window_bounds = array<i64: 4, 32, 1>}, {pipeline_mode = #tpu.pipeline_mode<synchronous>, transform_indices = @transform_2, window_bounds = array<i64: 1, 32, 1>}, {pipeline_mode = #tpu.pipeline_mode<synchronous>, transform_indices = @transform_3, window_bounds = array<i64: 32, 32>}, {pipeline_mode = #tpu.pipeline_mode<synchronous>, transform_indices = @transform_4, window_bounds = array<i64: 32, 32>}, {pipeline_mode = #tpu.pipeline_mode<synchronous>, transform_indices = @transform_5, window_bounds = array<i64: 1, 32>}, {pipeline_mode = #tpu.pipeline_mode<synchronous>, transform_indices = @transform_6, window_bounds = array<i64: 32, 128>}, {pipeline_mode = #tpu.pipeline_mode<synchronous>, transform_indices = @transform_7, window_bounds = array<i64: 1, 128>}, {pipeline_mode = #tpu.pipeline_mode<synchronous>, transform_indices = @transform_8, window_bounds = array<i64: 64, 128>}]} {
    %c0 = arith.constant 0 : index
    %c0_0 = arith.constant 0 : index
    %c0_1 = arith.constant 0 : index
    %0 = vector.load %arg1[%c0, %c0_0, %c0_1] : memref<8x4x256xf32, #tpu.memory_space<vmem>>, vector<8x4x256xf32>
    %c0_2 = arith.constant 0 : index
    %c0_3 = arith.constant 0 : index
    %c0_4 = arith.constant 0 : index
    %1 = vector.load %arg2[%c0_2, %c0_3, %c0_4] : memref<4x32x1xf32, #tpu.memory_space<vmem>>, vector<4x32x1xf32>
    %c0_5 = arith.constant 0 : index
    %c0_6 = arith.constant 0 : index
    %c0_7 = arith.constant 0 : index
    %2 = vector.load %arg3[%c0_5, %c0_6, %c0_7] : memref<1x32x1xf32, #tpu.memory_space<vmem>>, vector<1x32x1xf32>
    %3 = vector.shape_cast %2 : vector<1x32x1xf32> to vector<1x32x1xf32>
    %4 = vector.broadcast %3 : vector<1x32x1xf32> to vector<8x32x256xf32>
    %5 = vector.extract_strided_slice %1 {offsets = [0, 0, 0], sizes = [1, 32, 1], strides = [1, 1, 1]} : vector<4x32x1xf32> to vector<1x32x1xf32>
    %6 = vector.shape_cast %5 : vector<1x32x1xf32> to vector<32x1xf32>
    %7 = vector.extract_strided_slice %0 {offsets = [0, 0, 0], sizes = [8, 1, 256], strides = [1, 1, 1]} : vector<8x4x256xf32> to vector<8x1x256xf32>
    %8 = vector.shape_cast %7 : vector<8x1x256xf32> to vector<8x256xf32>
    %9 = vector.shape_cast %8 : vector<8x256xf32> to vector<8x1x256xf32>
    %10 = vector.shape_cast %6 : vector<32x1xf32> to vector<1x32x1xf32>
    %11 = vector.broadcast %10 : vector<1x32x1xf32> to vector<8x32x256xf32>
    %12 = vector.broadcast %9 : vector<8x1x256xf32> to vector<8x32x256xf32>
    %13 = arith.mulf %11, %12 : vector<8x32x256xf32>
    %14 = arith.addf %4, %13 : vector<8x32x256xf32>
    %15 = vector.extract_strided_slice %1 {offsets = [1, 0, 0], sizes = [1, 32, 1], strides = [1, 1, 1]} : vector<4x32x1xf32> to vector<1x32x1xf32>
    %16 = vector.shape_cast %15 : vector<1x32x1xf32> to vector<32x1xf32>
    %17 = vector.extract_strided_slice %0 {offsets = [0, 1, 0], sizes = [8, 1, 256], strides = [1, 1, 1]} : vector<8x4x256xf32> to vector<8x1x256xf32>
    %18 = vector.shape_cast %17 : vector<8x1x256xf32> to vector<8x256xf32>
    %19 = vector.shape_cast %18 : vector<8x256xf32> to vector<8x1x256xf32>
    %20 = vector.shape_cast %16 : vector<32x1xf32> to vector<1x32x1xf32>
    %21 = vector.broadcast %20 : vector<1x32x1xf32> to vector<8x32x256xf32>
    %22 = vector.broadcast %19 : vector<8x1x256xf32> to vector<8x32x256xf32>
    %23 = arith.mulf %21, %22 : vector<8x32x256xf32>
    %24 = arith.addf %14, %23 : vector<8x32x256xf32>
    %25 = vector.extract_strided_slice %1 {offsets = [2, 0, 0], sizes = [1, 32, 1], strides = [1, 1, 1]} : vector<4x32x1xf32> to vector<1x32x1xf32>
    %26 = vector.shape_cast %25 : vector<1x32x1xf32> to vector<32x1xf32>
    %27 = vector.extract_strided_slice %0 {offsets = [0, 2, 0], sizes = [8, 1, 256], strides = [1, 1, 1]} : vector<8x4x256xf32> to vector<8x1x256xf32>
    %28 = vector.shape_cast %27 : vector<8x1x256xf32> to vector<8x256xf32>
    %29 = vector.shape_cast %28 : vector<8x256xf32> to vector<8x1x256xf32>
    %30 = vector.shape_cast %26 : vector<32x1xf32> to vector<1x32x1xf32>
    %31 = vector.broadcast %30 : vector<1x32x1xf32> to vector<8x32x256xf32>
    %32 = vector.broadcast %29 : vector<8x1x256xf32> to vector<8x32x256xf32>
    %33 = arith.mulf %31, %32 : vector<8x32x256xf32>
    %34 = arith.addf %24, %33 : vector<8x32x256xf32>
    %35 = vector.extract_strided_slice %1 {offsets = [3, 0, 0], sizes = [1, 32, 1], strides = [1, 1, 1]} : vector<4x32x1xf32> to vector<1x32x1xf32>
    %36 = vector.shape_cast %35 : vector<1x32x1xf32> to vector<32x1xf32>
    %37 = vector.extract_strided_slice %0 {offsets = [0, 3, 0], sizes = [8, 1, 256], strides = [1, 1, 1]} : vector<8x4x256xf32> to vector<8x1x256xf32>
    %38 = vector.shape_cast %37 : vector<8x1x256xf32> to vector<8x256xf32>
    %39 = vector.shape_cast %38 : vector<8x256xf32> to vector<8x1x256xf32>
    %40 = vector.shape_cast %36 : vector<32x1xf32> to vector<1x32x1xf32>
    %41 = vector.broadcast %40 : vector<1x32x1xf32> to vector<8x32x256xf32>
    %42 = vector.broadcast %39 : vector<8x1x256xf32> to vector<8x32x256xf32>
    %43 = arith.mulf %41, %42 : vector<8x32x256xf32>
    %44 = arith.addf %34, %43 : vector<8x32x256xf32>
    %cst = arith.constant 0.000000e+00 : f32
    %45 = vector.broadcast %cst : f32 to vector<8x32x256xf32>
    %46 = arith.maximumf %44, %45 : vector<8x32x256xf32>
    %cst_8 = arith.constant dense<0.000000e+00> : vector<8x32xf32>
    %47 = vector.multi_reduction <add>, %46, %cst_8 [2] : vector<8x32x256xf32> to vector<8x32xf32>
    %cst_9 = arith.constant 2.560000e+02 : f32
    %48 = vector.broadcast %cst_9 : f32 to vector<8x32xf32>
    %49 = arith.divf %47, %48 : vector<8x32xf32>
    %c0_10 = arith.constant 0 : index
    %c0_11 = arith.constant 0 : index
    %50 = vector.load %arg4[%c0_10, %c0_11] : memref<32x32xf32, #tpu.memory_space<vmem>>, vector<32x32xf32>
    %cst_12 = arith.constant dense<0.000000e+00> : vector<8x32xf32>
    %51 = tpu.matmul %49, %50, %cst_12 {dimension_numbers = #tpu.dot_dimension_numbers<[1], [0], [0], [1], [0, 0, 1, 1], [], []>} : vector<8x32xf32>, vector<32x32xf32>, vector<8x32xf32> -> vector<8x32xf32>
    %c0_13 = arith.constant 0 : index
    %c0_14 = arith.constant 0 : index
    %52 = vector.load %arg6[%c0_13, %c0_14] : memref<1x32xf32, #tpu.memory_space<vmem>>, vector<1x32xf32>
    %53 = vector.broadcast %52 : vector<1x32xf32> to vector<8x32xf32>
    %54 = arith.addf %51, %53 : vector<8x32xf32>
    %55 = vector.shape_cast %54 : vector<8x32xf32> to vector<2x4x32xf32>
    %c0_15 = arith.constant 0 : index
    %c0_16 = arith.constant 0 : index
    %56 = vector.load %arg5[%c0_15, %c0_16] : memref<32x32xf32, #tpu.memory_space<vmem>>, vector<32x32xf32>
    %57 = vector.extract_strided_slice %55 {offsets = [0, 0, 0], sizes = [2, 1, 32], strides = [1, 1, 1]} : vector<2x4x32xf32> to vector<2x1x32xf32>
    %58 = vector.shape_cast %57 : vector<2x1x32xf32> to vector<2x32xf32>
    %59 = vector.shape_cast %58 : vector<2x32xf32> to vector<2x1x32xf32>
    %60 = vector.shape_cast %59 : vector<2x1x32xf32> to vector<2x1x32xf32>
    %61 = vector.broadcast %60 : vector<2x1x32xf32> to vector<2x8x32xf32>
    %62 = vector.shape_cast %61 : vector<2x8x32xf32> to vector<16x32xf32>
    %63 = math.tanh %62 : vector<16x32xf32>
    %cst_17 = arith.constant dense<0.000000e+00> : vector<16x32xf32>
    %64 = tpu.matmul %63, %56, %cst_17 {dimension_numbers = #tpu.dot_dimension_numbers<[1], [0], [0], [1], [0, 0, 1, 1], [], []>} : vector<16x32xf32>, vector<32x32xf32>, vector<16x32xf32> -> vector<16x32xf32>
    %65 = vector.extract_strided_slice %55 {offsets = [0, 1, 0], sizes = [2, 1, 32], strides = [1, 1, 1]} : vector<2x4x32xf32> to vector<2x1x32xf32>
    %66 = vector.shape_cast %65 : vector<2x1x32xf32> to vector<2x32xf32>
    %67 = vector.shape_cast %66 : vector<2x32xf32> to vector<2x1x32xf32>
    %68 = vector.shape_cast %67 : vector<2x1x32xf32> to vector<2x1x32xf32>
    %69 = vector.broadcast %68 : vector<2x1x32xf32> to vector<2x8x32xf32>
    %70 = vector.shape_cast %69 : vector<2x8x32xf32> to vector<16x32xf32>
    %71 = arith.addf %64, %70 : vector<16x32xf32>
    %72 = math.tanh %71 : vector<16x32xf32>
    %cst_18 = arith.constant dense<0.000000e+00> : vector<16x32xf32>
    %73 = tpu.matmul %72, %56, %cst_18 {dimension_numbers = #tpu.dot_dimension_numbers<[1], [0], [0], [1], [0, 0, 1, 1], [], []>} : vector<16x32xf32>, vector<32x32xf32>, vector<16x32xf32> -> vector<16x32xf32>
    %74 = vector.extract_strided_slice %55 {offsets = [0, 2, 0], sizes = [2, 1, 32], strides = [1, 1, 1]} : vector<2x4x32xf32> to vector<2x1x32xf32>
    %75 = vector.shape_cast %74 : vector<2x1x32xf32> to vector<2x32xf32>
    %76 = vector.shape_cast %75 : vector<2x32xf32> to vector<2x1x32xf32>
    %77 = vector.shape_cast %76 : vector<2x1x32xf32> to vector<2x1x32xf32>
    %78 = vector.broadcast %77 : vector<2x1x32xf32> to vector<2x8x32xf32>
    %79 = vector.shape_cast %78 : vector<2x8x32xf32> to vector<16x32xf32>
    %80 = arith.addf %73, %79 : vector<16x32xf32>
    %81 = math.tanh %80 : vector<16x32xf32>
    %cst_19 = arith.constant dense<0.000000e+00> : vector<16x32xf32>
    %82 = tpu.matmul %81, %56, %cst_19 {dimension_numbers = #tpu.dot_dimension_numbers<[1], [0], [0], [1], [0, 0, 1, 1], [], []>} : vector<16x32xf32>, vector<32x32xf32>, vector<16x32xf32> -> vector<16x32xf32>
    %83 = vector.extract_strided_slice %55 {offsets = [0, 3, 0], sizes = [2, 1, 32], strides = [1, 1, 1]} : vector<2x4x32xf32> to vector<2x1x32xf32>
    %84 = vector.shape_cast %83 : vector<2x1x32xf32> to vector<2x32xf32>
    %85 = vector.shape_cast %84 : vector<2x32xf32> to vector<2x1x32xf32>
    %86 = vector.shape_cast %85 : vector<2x1x32xf32> to vector<2x1x32xf32>
    %87 = vector.broadcast %86 : vector<2x1x32xf32> to vector<2x8x32xf32>
    %88 = vector.shape_cast %87 : vector<2x8x32xf32> to vector<16x32xf32>
    %89 = arith.addf %82, %88 : vector<16x32xf32>
    %90 = math.tanh %89 : vector<16x32xf32>
    %91 = tpu.concatenate %63, %72, %81, %90 in 0 : vector<16x32xf32>, vector<16x32xf32>, vector<16x32xf32>, vector<16x32xf32> -> vector<64x32xf32>
    %c0_20 = arith.constant 0 : index
    %c0_21 = arith.constant 0 : index
    %92 = vector.load %arg7[%c0_20, %c0_21] : memref<32x128xf32, #tpu.memory_space<vmem>>, vector<32x128xf32>
    %cst_22 = arith.constant dense<0.000000e+00> : vector<64x128xf32>
    %93 = tpu.matmul %91, %92, %cst_22 {dimension_numbers = #tpu.dot_dimension_numbers<[1], [0], [0], [1], [0, 0, 1, 1], [], []>} : vector<64x32xf32>, vector<32x128xf32>, vector<64x128xf32> -> vector<64x128xf32>
    %c0_23 = arith.constant 0 : index
    %c0_24 = arith.constant 0 : index
    %94 = vector.load %arg8[%c0_23, %c0_24] : memref<1x128xf32, #tpu.memory_space<vmem>>, vector<1x128xf32>
    %95 = vector.broadcast %94 : vector<1x128xf32> to vector<64x128xf32>
    %96 = arith.addf %93, %95 : vector<64x128xf32>
    %97 = tpu.iota {dimensions = array<i32: 1>} : vector<64x128xi32>
    %c8_i32 = arith.constant 8 : i32
    %98 = vector.broadcast %c8_i32 : i32 to vector<64x128xi32>
    %99 = arith.cmpi slt, %97, %98 : vector<64x128xi32>
    %100 = arith.negf %96 : vector<64x128xf32>
    %101 = math.exp %100 : vector<64x128xf32>
    %cst_25 = arith.constant 1.000000e+00 : f32
    %102 = vector.broadcast %cst_25 : f32 to vector<64x128xf32>
    %103 = arith.addf %102, %101 : vector<64x128xf32>
    %104 = arith.divf %102, %103 : vector<64x128xf32>
    %105 = arith.select %99, %96, %104 : vector<64x128xi1>, vector<64x128xf32>
    %c0_26 = arith.constant 0 : index
    %c0_27 = arith.constant 0 : index
    %106 = vector.load %arg9[%c0_26, %c0_27] : memref<64x128xf32, #tpu.memory_space<vmem>>, vector<64x128xf32>
    tpu.vector_store %arg9[%c0_26, %c0_27], %105 {strides = array<i32>} : memref<64x128xf32, #tpu.memory_space<vmem>>, vector<64x128xf32>,
    return
  }
  func.func @transform_0(%arg0: i32) -> (i32, i32, i32) {
    %c0_i32 = arith.constant 0 : i32
    %c0_i32_0 = arith.constant 0 : i32
    %c0_i32_1 = arith.constant 0 : i32
    %c0_i32_2 = arith.constant 0 : i32
    return %c0_i32, %c0_i32_0, %c0_i32_1 : i32, i32, i32
  }
  func.func @transform_1(%arg0: i32) -> (i32, i32, i32) {
    %c0_i32 = arith.constant 0 : i32
    %c0_i32_0 = arith.constant 0 : i32
    %c0_i32_1 = arith.constant 0 : i32
    %c0_i32_2 = arith.constant 0 : i32
    return %c0_i32, %c0_i32_0, %c0_i32_1 : i32, i32, i32
  }
  func.func @transform_2(%arg0: i32) -> (i32, i32, i32) {
    %c0_i32 = arith.constant 0 : i32
    %c0_i32_0 = arith.constant 0 : i32
    %c0_i32_1 = arith.constant 0 : i32
    %c0_i32_2 = arith.constant 0 : i32
    return %c0_i32, %c0_i32_0, %c0_i32_1 : i32, i32, i32
  }
  func.func @transform_3(%arg0: i32) -> (i32, i32) {
    %c0_i32 = arith.constant 0 : i32
    %c0_i32_0 = arith.constant 0 : i32
    %c0_i32_1 = arith.constant 0 : i32
    return %c0_i32, %c0_i32_0 : i32, i32
  }
  func.func @transform_4(%arg0: i32) -> (i32, i32) {
    %c0_i32 = arith.constant 0 : i32
    %c0_i32_0 = arith.constant 0 : i32
    %c0_i32_1 = arith.constant 0 : i32
    return %c0_i32, %c0_i32_0 : i32, i32
  }
  func.func @transform_5(%arg0: i32) -> (i32, i32) {
    %c0_i32 = arith.constant 0 : i32
    %c0_i32_0 = arith.constant 0 : i32
    %c0_i32_1 = arith.constant 0 : i32
    return %c0_i32, %c0_i32_0 : i32, i32
  }
  func.func @transform_6(%arg0: i32) -> (i32, i32) {
    %c0_i32 = arith.constant 0 : i32
    %c0_i32_0 = arith.constant 0 : i32
    %c0_i32_1 = arith.constant 0 : i32
    return %c0_i32, %c0_i32_0 : i32, i32
  }
  func.func @transform_7(%arg0: i32) -> (i32, i32) {
    %c0_i32 = arith.constant 0 : i32
    %c0_i32_0 = arith.constant 0 : i32
    %c0_i32_1 = arith.constant 0 : i32
    return %c0_i32, %c0_i32_0 : i32, i32
  }
  func.func @transform_8(%arg0: i32) -> (i32, i32) {
    %c0_i32 = arith.constant 0 : i32
    %c0_i32_0 = arith.constant 0 : i32
    %c0_i32_1 = arith.constant 0 : i32
    return %c0_i32, %c0_i32_0 : i32, i32
  }
}

</mosaic_0001>

<bundles_post_ra>
// kernel: tpu_custom_call.1
= control target key start
LH: loop header
LB: loop body
LE: loop exit
PB: predicated region body
PF: predicated region fallthrough
CT: control target
= control target key end

     0   :  { %v1679_v3 = vmov 0   ;;  %s2999_s0 = inlined_call_operand.vmem [shape: f32[8,4,256], index: 0, kind: input, shape index: {}]   ;;  %s3000_s1 = inlined_call_operand.vmem [shape: f32[4,32,1], index: 1, kind: input, shape index: {}]   ;;  %s3001_s2 = inlined_call_operand.vmem [shape: f32[1,32,1], index: 2, kind: input, shape index: {}]   ;;  %s3002_s3 = inlined_call_operand.vmem [shape: f32[32,32], index: 3, kind: input, shape index: {}]   ;;  %s3003_s4 = inlined_call_operand.vmem [shape: f32[32,32], index: 4, kind: input, shape index: {}]   ;;  %s3004_s5 = inlined_call_operand.vmem [shape: f32[1,32], index: 5, kind: input, shape index: {}]   ;;  %s3005_s6 = inlined_call_operand.vmem [shape: f32[32,128], index: 6, kind: input, shape index: {}]   ;;  %s3006_s7 = inlined_call_operand.vmem [shape: f32[1,128], index: 7, kind: input, shape index: {}]   ;;  %s3007_s8 = inlined_call_operand.hbm [shape: f32[64,128], index: 8, kind: output, shape index: {}]  }
   0x1   :  { %v55_v0 = vld [vmem:[%s3001_s2 + $0x8] sm:$0xff]  ;;  %v40_v1 = vld [vmem:[%s3000_s1 + $0x10] sm:$0xff]  ;;  %v38_v2 = vld [vmem:[%s3000_s1] sm:$0xff]  ;;  %1600 = vset.pattern.permute.xlu2 %v1679_v3  ;;  %1599 = vset.pattern.permute.xlu1 %v1679_v3 }
   0x2   :  { %1598 = vset.pattern.permute.xlu0 %v1679_v3  ;;  %65 = vperm.xlu2 %1600, %v55_v0  }
   0x3   :  { %90 = vperm.xlu1 %1599, %v40_v1   ;;  %80 = vperm.xlu0 %1598, %v38_v2  }
   0x4   :  { %13 = vsyncpa [#allocation3], 0  ;;  %v41_v4 = vld [vmem:[%s3000_s1 + $0x18] sm:$0xff]  ;;  %v54_v5 = vld [vmem:[%s3001_s2] sm:$0xff]  ;;  %vm1114_vm1 = vcmask 130112   ;;  %vm1118_vm2 = vcmask 195712  }
   0x5   :  { %v39_v6 = vld [vmem:[%s3000_s1 + $0x8] sm:$0xff]  ;;  %v56_v7 = vld [vmem:[%s3001_s2 + $0x10] sm:$0xff]  ;;  %v42_v9 = vld [vmem:[%s3000_s1 + $0x20] sm:$0xff]  ;;  %vm1122_vm3 = vcmask 261312   ;;  %vm1173_vm4 = vcmask 1041409   ;;  %vm1175_vm5 = vcmask 1042434  }
   0x6   :  { %v43_v8 = vld [vmem:[%s3000_s1 + $0x28] sm:$0xff]  ;;  %v45_v10 = vld [vmem:[%s3000_s1 + $0x38] sm:$0xff]  ;;  %v44_v12 = vld [vmem:[%s3000_s1 + $0x30] sm:$0xff]  ;;  %vm1177_vm6 = vcmask 1043459   ;;  %vm1179_vm7 = vcmask 1044484   ;;  %vm1181_vm8 = vcmask 1045509  }
   0x7   :  { %v57_v11 = vld [vmem:[%s3001_s2 + $0x18] sm:$0xff]  ;;  %v48_v13 = vld [vmem:[%s3000_s1 + $0x50] sm:$0xff]  ;;  %v47_v14 = vld [vmem:[%s3000_s1 + $0x48] sm:$0xff]  ;;  %vm1183_vm9 = vcmask 1046534   ;;  %vm1185_vm10 = vcmask 1047559   ;;  %vm1187_vm11 = vcmask 261120  }
   0x8   :  { %v46_v15 = vld [vmem:[%s3000_s1 + $0x40] sm:$0xff]  ;;  %v51_v16 = vld [vmem:[%s3000_s1 + $0x68] sm:$0xff]  ;;  %v49_v18 = vld [vmem:[%s3000_s1 + $0x58] sm:$0xff]  ;;  %s1550_s15 = sshll.u32 %s3007_s8, 4  ;;  %s1682_s16 = smov 128   ;;  %s1551_s15 = int_to_ptr.hbm [resolvable:$true] %s1550_s15 }
   0x9   :  { %v50_v17 = vld [vmem:[%s3000_s1 + $0x60] sm:$0xff]  ;;  %v53_v19 = vld [vmem:[%s3000_s1 + $0x78] sm:$0xff]  ;;  %v52_v20 = vld [vmem:[%s3000_s1 + $0x70] sm:$0xff]  ;;  %s1683_s17 = smov 8  }
   0xa   :  { %95 = vperm.xlu2 %1600, %v41_v4   ;;  %v30_v22 = vld [vmem:[%s2999_s0] sm:$0xff]  ;;  %v1797_v23 = vld [vmem:[%s2999_s0 + $0x8] sm:$0xff]  ;;  %v1802_v26 = vld [vmem:[%s2999_s0 + $0x10] sm:$0xff] }
   0xb   :  { %60 = vperm.xlu1 %1599, %v54_v5   ;;  %85 = vperm.xlu0 %1598, %v39_v6   ;;  %v106_v24 = vperm.slane %v30_v22, 0  ;;  %v107_v25 = vperm.slane %v30_v22, 4  ;;  %v108_v28 = vperm.slane %v1797_v23, 0  ;;  %v109_v29 = vperm.slane %v1797_v23, 4  ;;  %v1817_v36 = vld [vmem:[%s2999_s0 + $0x18] sm:$0xff] }
   0xc   :  { %v110_v30 = vperm.slane %v1802_v26, 0  ;;  %v111_v31 = vperm.slane %v1802_v26, 4  ;;  %v302_v34 = vperm.slane %v30_v22, 1  ;;  %v303_v35 = vperm.slane %v30_v22, 5 }
   0xd   :  { %v1810_v32 = vperm.slane %v106_v24, 0  ;;  %v1812_v33 = vperm.slane %v107_v25, 0  ;;  %v498_v37 = vperm.slane %v30_v22, 2  ;;  %v499_v38 = vperm.slane %v30_v22, 6 }
   0xe   :  { %v304_v39 = vperm.slane %v1797_v23, 1  ;;  %v305_v40 = vperm.slane %v1797_v23, 5  ;;  %v1821_v41 = vperm.slane %v108_v28, 0  ;;  %v1823_v42 = vperm.slane %v109_v29, 0 }
   0xf   :  { %v500_v43 = vperm.slane %v1797_v23, 2  ;;  %v501_v44 = vperm.slane %v1797_v23, 6  ;;  %v1827_v45 = vperm.slane %v110_v30, 0  ;;  %v1829_v46 = vperm.slane %v111_v31, 0 }
  0x10   :  { %v112_v47 = vperm.slane %v1817_v36, 0  ;;  %v113_v48 = vperm.slane %v1817_v36, 4  ;;  %v1833_v49 = vperm.slane %v302_v34, 1  ;;  %v1835_v50 = vperm.slane %v303_v35, 1 }
  0x11   :  { %3094 = vst [vmem:[#allocation7_spill] sm:$0xff] %v1827_v45  ;;  %v306_v51 = vperm.slane %v1802_v26, 1  ;;  %v307_v52 = vperm.slane %v1802_v26, 5  ;;  %v1839_v53 = vperm.slane %v498_v37, 2  ;;  %v1841_v54 = vperm.slane %v499_v38, 2 }
  0x12   :  { %70 = vperm.xlu2 %1600, %v56_v7   ;;  %3095 = vst [vmem:[#allocation8_spill] sm:$0xff] %v1829_v46  ;;  %v1843_v55 = vperm.slane %v304_v39, 1  ;;  %v1845_v56 = vperm.slane %v305_v40, 1  ;;  %v1849_v58 = vperm.slane %v500_v43, 2  ;;  %v1851_v59 = vperm.slane %v501_v44, 2 }
  0x13   :  { %289 = vperm.xlu1 %1599, %v43_v8   ;;  %284 = vperm.xlu0 %1598, %v42_v9   ;;  %3096 = vst [vmem:[#allocation9_spill] sm:$0xff] %v1839_v53  ;;  %v502_v60 = vperm.slane %v1802_v26, 2  ;;  %v503_v61 = vperm.slane %v1802_v26, 6  ;;  %v1855_v62 = vperm.slane %v112_v47, 0  ;;  %v1857_v63 = vperm.slane %v113_v48, 0 }
  0x14   :  { %3097 = vst [vmem:[#allocation10_spill] sm:$0xff] %v1841_v54  ;;  %v308_v0 = vperm.slane %v1817_v36, 1  ;;  %v309_v1 = vperm.slane %v1817_v36, 5  ;;  %v694_v2 = vperm.slane %v30_v22, 3  ;;  %v695_v3 = vperm.slane %v30_v22, 7 }
  0x15   :  { %3099 = vst [vmem:[#allocation12_spill] sm:$0xff] %v1849_v58  ;;  %v1861_v4 = vperm.slane %v306_v51, 1  ;;  %v1863_v5 = vperm.slane %v307_v52, 1  ;;  %v696_v6 = vperm.slane %v1797_v23, 3  ;;  %v697_v7 = vperm.slane %v1797_v23, 7 }
  0x16   :  { %3100 = vst [vmem:[#allocation13_spill] sm:$0xff] %v1851_v59  ;;  %v698_v8 = vperm.slane %v1802_v26, 3  ;;  %v699_v9 = vperm.slane %v1802_v26, 7 }
  0x17   :  { %3101 = vst [vmem:[#allocation14_spill] sm:$0xff] %v1855_v62  ;;  %v1892_v24 = vperm.slane %v696_v6, 3  ;;  %v1894_v25 = vperm.slane %v697_v7, 3 }
  0x18   :  { %3102 = vst [vmem:[#allocation15_spill] sm:$0xff] %v1857_v63  ;;  %v1896_v26 = vperm.slane %v698_v8, 3  ;;  %v1898_v28 = vperm.slane %v699_v9, 3 }
  0x19   :  { %3103 = vst [vmem:[#allocation16_spill] sm:$0xff] %v1861_v4 }
  0x1a   :  { %299 = vperm.xlu2 %1600, %v45_v10   ;;  %3104 = vst [vmem:[#allocation17_spill] sm:$0xff] %v1863_v5  ;;  %v1872_v10 = vld [vmem:[%s2999_s0 + $0x20] sm:$0xff] }
  0x1b   :  { %75 = vperm.xlu1 %1599, %v57_v11   ;;  %294 = vperm.xlu0 %1598, %v44_v12   ;;  %3105 = vst [vmem:[#allocation18_spill] sm:$0xff] %v1872_v10  ;;  %v1874_v11 = vperm.slane %v502_v60, 2  ;;  %v1876_v12 = vperm.slane %v503_v61, 2  ;;  %v114_v22 = vperm.slane %v1872_v10, 0  ;;  %v115_v23 = vperm.slane %v1872_v10, 4 }
  0x1c   :  { %3112 = vst [vmem:[#allocation25_spill] sm:$0xff] %v1892_v24  ;;  %v310_v48 = vperm.slane %v1872_v10, 1  ;;  %v311_v51 = vperm.slane %v1872_v10, 5 }
  0x1d   :  { %3106 = vst [vmem:[#allocation19_spill] sm:$0xff] %v1874_v11  ;;  %v1930_v44 = vperm.slane %v114_v22, 0  ;;  %v1932_v47 = vperm.slane %v115_v23, 0 }
  0x1e   :  { %3107 = vst [vmem:[#allocation20_spill] sm:$0xff] %v1876_v12 }
  0x1f   :  { %3113 = vst [vmem:[#allocation26_spill] sm:$0xff] %v1894_v25 }
  0x20   :  { %3114 = vst [vmem:[#allocation27_spill] sm:$0xff] %v1896_v26 }
  0x21   :  { %3115 = vst [vmem:[#allocation28_spill] sm:$0xff] %v1898_v28 }
  0x22   :  { %490 = vperm.xlu2 %1600, %v48_v13   ;;  %v504_v13 = vperm.slane %v1817_v36, 2  ;;  %3121 = vst [vmem:[#allocation34_spill] sm:$0xff] %v1930_v44 }
  0x23   :  { %485 = vperm.xlu1 %1599, %v47_v14   ;;  %480 = vperm.xlu0 %1598, %v46_v15   ;;  %v505_v14 = vperm.slane %v1817_v36, 6  ;;  %v1880_v15 = vperm.slane %v308_v0, 1  ;;  %3122 = vst [vmem:[#allocation35_spill] sm:$0xff] %v1932_v47 }
  0x24   :  { %v1922_v38 = vperm.slane %v504_v13, 2 }
  0x25   :  { %3108 = vst [vmem:[#allocation21_spill] sm:$0xff] %v1880_v15  ;;  %v1924_v39 = vperm.slane %v505_v14, 2 }
  0x26   :  { %3119 = vst [vmem:[#allocation32_spill] sm:$0xff] %v1922_v38 }
  0x27   :  { %3120 = vst [vmem:[#allocation33_spill] sm:$0xff] %v1924_v39 }
  0x2a   :  { %681 = vperm.xlu2 %1600, %v51_v16   ;;  %v1882_v16 = vperm.slane %v309_v1, 1 }
  0x2b   :  { %676 = vperm.xlu1 %1599, %v50_v17   ;;  %495 = vperm.xlu0 %1598, %v49_v18   ;;  %v700_v17 = vperm.slane %v1817_v36, 3  ;;  %v701_v18 = vperm.slane %v1817_v36, 7 }
  0x2c   :  { %3109 = vst [vmem:[#allocation22_spill] sm:$0xff] %v1882_v16 }
  0x2d   :  { %v1926_v40 = vperm.slane %v700_v17, 3  ;;  %v1928_v43 = vperm.slane %v701_v18, 3 }
  0x33   :  { %691 = vperm.xlu1 %1599, %v53_v19   ;;  %686 = vperm.xlu0 %1598, %v52_v20   ;;  %v1886_v19 = vperm.slane %v694_v2, 3  ;;  %v1888_v20 = vperm.slane %v695_v3, 3 }
  0x35   :  { %3110 = vst [vmem:[#allocation23_spill] sm:$0xff] %v1886_v19 }
  0x36   :  { %3111 = vst [vmem:[#allocation24_spill] sm:$0xff] %v1888_v20 }
  0x5c   :  { %v1789_v21 = vpop.permute.xlu2 %65 }
  0x5d   :  { %3092 = vst [vmem:[#allocation5_spill] sm:$0xff] %v1789_v21 }
  0x64   :  { %v1804_v27 = vpop.permute.xlu2 %95 }
  0x65   :  { %3093 = vst [vmem:[#allocation6_spill] sm:$0xff] %v1804_v27  ;;  %v1904_v30 = vmul.f32 %v1821_v41, %v1804_v27  ;;  %v1908_v31 = vmul.f32 %v1823_v42, %v1804_v27  ;;  %v1912_v34 = vmul.f32 %v1810_v32, %v1804_v27  ;;  %v1916_v35 = vmul.f32 %v1812_v33, %v1804_v27 }
  0x6c   :  { %v1847_v57 = vpop.permute.xlu2 %70 }
  0x6d   :  { %3098 = vst [vmem:[#allocation11_spill] sm:$0xff] %v1847_v57 }
  0x74   :  { %v1900_v29 = vpop.permute.xlu2 %299 }
  0x75   :  { %3116 = vst [vmem:[#allocation29_spill] sm:$0xff] %v1900_v29  ;;  %v1918_v36 = vpop.permute.xlu1 %90  ;;  %v1920_v37 = vpop.permute.xlu0 %80  ;;  %v1942_v61 = vmul.f32 %v1843_v55, %v1900_v29  ;;  %v1946_v0 = vmul.f32 %v1845_v56, %v1900_v29  ;;  %v1950_v1 = vmul.f32 %v1833_v49, %v1900_v29  ;;  %v1954_v2 = vmul.f32 %v1835_v50, %v1900_v29 }
  0x76   :  { %3117 = vst [vmem:[#allocation30_spill] sm:$0xff] %v1918_v36  ;;  %v166_v52 = vmul.f32 %v1821_v41, %v1918_v36  ;;  %v167_v60 = vmul.f32 %v1823_v42, %v1918_v36  ;;  %v158_v3 = vmul.f32 %v1810_v32, %v1918_v36  ;;  %v159_v6 = vmul.f32 %v1812_v33, %v1918_v36 }
  0x77   :  { %3118 = vst [vmem:[#allocation31_spill] sm:$0xff] %v1920_v37  ;;  %v162_v7 = vmul.f32 %v1821_v41, %v1920_v37  ;;  %v163_v8 = vmul.f32 %v1823_v42, %v1920_v37  ;;  %v154_v9 = vmul.f32 %v1810_v32, %v1920_v37  ;;  %v155_v13 = vmul.f32 %v1812_v33, %v1920_v37 }
  0x78   :  { %v170_v14 = vmul.f32 %v1827_v45, %v1920_v37  ;;  %v171_v17 = vmul.f32 %v1829_v46, %v1920_v37  ;;  %v178_v18 = vmul.f32 %v1855_v62, %v1920_v37  ;;  %v179_v22 = vmul.f32 %v1857_v63, %v1920_v37 }
  0x79   :  { %v1977_v23 = vadd.f32 %v166_v52, %v1847_v57  ;;  %v1980_v29 = vadd.f32 %v167_v60, %v1847_v57  ;;  %v186_v27 = vmul.f32 %v1930_v44, %v1920_v37  ;;  %v187_v39 = vmul.f32 %v1932_v47, %v1920_v37 }
  0x7a   :  { %v1989_v12 = vadd.f32 %v158_v3, %v1847_v57  ;;  %v1992_v11 = vadd.f32 %v159_v6, %v1847_v57  ;;  %v1994_v36 = vperm.slane %v310_v48, 1  ;;  %v1996_v52 = vperm.slane %v311_v51, 1 }
  0x7c   :  { %v1986_v38 = vpop.permute.xlu2 %490  ;;  %3124 = vst [vmem:[#allocation37_spill] sm:$0xff] %v1994_v36 }
  0x7d   :  { %3123 = vst [vmem:[#allocation36_spill] sm:$0xff] %v1986_v38  ;;  %v1998_v60 = vpop.permute.xlu1 %60  ;;  %v2000_v28 = vpop.permute.xlu0 %85  ;;  %v2004_v44 = vmul.f32 %v1849_v58, %v1986_v38  ;;  %v2008_v37 = vmul.f32 %v1851_v59, %v1986_v38  ;;  %v2012_v3 = vmul.f32 %v1839_v53, %v1986_v38  ;;  %v2016_v48 = vmul.f32 %v1841_v54, %v1986_v38 }
  0x7e   :  { %3125 = vst [vmem:[#allocation38_spill] sm:$0xff] %v1996_v52  ;;  %v156_v51 = vmul.f32 %v1810_v32, %v2000_v28  ;;  %v157_v6 = vmul.f32 %v1812_v33, %v2000_v28  ;;  %v226_v47 = vadd.f32 %v162_v7, %v1998_v60  ;;  %v227_v57 = vadd.f32 %v163_v8, %v1998_v60 }
  0x7f   :  { %3126 = vst [vmem:[#allocation39_spill] sm:$0xff] %v1998_v60  ;;  %v218_v59 = vadd.f32 %v154_v9, %v1998_v60  ;;  %v219_v58 = vadd.f32 %v155_v13, %v1998_v60  ;;  %v234_v53 = vadd.f32 %v170_v14, %v1998_v60  ;;  %v235_v52 = vadd.f32 %v171_v17, %v1998_v60 }
  0x80   :  { %3127 = vst [vmem:[#allocation40_spill] sm:$0xff] %v2000_v28  ;;  %v220_v38 = vadd.f32 %v156_v51, %v1789_v21  ;;  %v221_v54 = vadd.f32 %v157_v6, %v1789_v21  ;;  %v164_v32 = vmul.f32 %v1821_v41, %v2000_v28  ;;  %v165_v33 = vmul.f32 %v1823_v42, %v2000_v28 }
  0x81   :  { %v180_v7 = vmul.f32 %v1855_v62, %v2000_v28  ;;  %v181_v8 = vmul.f32 %v1857_v63, %v2000_v28  ;;  %v242_v9 = vadd.f32 %v178_v18, %v1998_v60  ;;  %v243_v13 = vadd.f32 %v179_v22, %v1998_v60 }
  0x82   :  { %v228_v14 = vadd.f32 %v164_v32, %v1789_v21  ;;  %v229_v17 = vadd.f32 %v165_v33, %v1789_v21  ;;  %v172_v41 = vmul.f32 %v1827_v45, %v2000_v28  ;;  %v173_v42 = vmul.f32 %v1829_v46, %v2000_v28 }
  0x83   :  { %v244_v51 = vadd.f32 %v180_v7, %v1789_v21  ;;  %v245_v6 = vadd.f32 %v181_v8, %v1789_v21  ;;  %v2049_v63 = vadd.f32 %v186_v27, %v1998_v60  ;;  %v2052_v18 = vadd.f32 %v187_v39, %v1998_v60 }
  0x84   :  { %v2054_v22 = vpop.permute.xlu2 %681  ;;  %v236_v32 = vadd.f32 %v172_v41, %v1789_v21  ;;  %v237_v33 = vadd.f32 %v173_v42, %v1789_v21 }
  0x85   :  { %3128 = vst [vmem:[#allocation41_spill] sm:$0xff] %v2049_v63  ;;  %v2060_v46 = vpop.permute.xlu1 %289  ;;  %v2062_v7 = vpop.permute.xlu0 %284  ;;  %v2066_v27 = vmul.f32 %v1886_v19, %v2054_v22  ;;  %v2070_v39 = vmul.f32 %v1888_v20, %v2054_v22  ;;  %v2074_v8 = vmul.f32 %v1892_v24, %v2054_v22  ;;  %v2078_v41 = vmul.f32 %v1894_v25, %v2054_v22 }
  0x86   :  { %3129 = vst [vmem:[#allocation42_spill] sm:$0xff] %v2052_v18  ;;  %v352_v42 = vmul.f32 %v1833_v49, %v2060_v46  ;;  %v353_v28 = vmul.f32 %v1835_v50, %v2060_v46  ;;  %v358_v45 = vmul.f32 %v1843_v55, %v2062_v7  ;;  %v359_v60 = vmul.f32 %v1845_v56, %v2062_v7 }
  0x87   :  { %3130 = vst [vmem:[#allocation43_spill] sm:$0xff] %v2054_v22  ;;  %v350_v21 = vmul.f32 %v1833_v49, %v2062_v7  ;;  %v351_v18 = vmul.f32 %v1835_v50, %v2062_v7  ;;  %v366_v63 = vmul.f32 %v1861_v4, %v2062_v7  ;;  %v360_v10 = vmul.f32 %v1843_v55, %v2060_v46 }
  0x88   :  { %3131 = vst [vmem:[#allocation44_spill] sm:$0xff] %v2060_v46  ;;  %v2098_v20 = vadd.f32 %v353_v28, %v221_v54  ;;  %v2100_v19 = vadd.f32 %v358_v45, %v226_v47  ;;  %v2102_v25 = vadd.f32 %v359_v60, %v227_v57  ;;  %v376_v45 = vmul.f32 %v1880_v15, %v2060_v46 }
  0x89   :  { %3132 = vst [vmem:[#allocation45_spill] sm:$0xff] %v2062_v7  ;;  %v2104_v24 = vadd.f32 %v350_v21, %v218_v59  ;;  %v377_v54 = vmul.f32 %v1882_v16, %v2060_v46  ;;  %v2122_v21 = vmul.f32 %v1926_v40, %v2054_v22  ;;  %v374_v57 = vmul.f32 %v1880_v15, %v2062_v7 }
  0x8a   :  { %3133 = vst [vmem:[#allocation46_spill] sm:$0xff] %v2066_v27  ;;  %v2108_v27 = vadd.f32 %v366_v63, %v234_v53  ;;  %v2126_v53 = vmul.f32 %v1928_v43, %v2054_v22  ;;  %v2132_v59 = vadd.f32 %v360_v10, %v228_v14  ;;  %v2136_v28 = vadd.f32 %v376_v45, %v244_v51 }
  0x8b   :  { %3134 = vst [vmem:[#allocation47_spill] sm:$0xff] %v2070_v39  ;;  %v2106_v39 = vadd.f32 %v351_v18, %v219_v58  ;;  %v375_v58 = vmul.f32 %v1882_v16, %v2062_v7  ;;  %v2138_v47 = vadd.f32 %v377_v54, %v245_v6  ;;  %v2144_v18 = vadd.f32 %v374_v57, %v242_v9 }
  0x8c   :  { %3135 = vst [vmem:[#allocation48_spill] sm:$0xff] %v2074_v8  ;;  %v2096_v8 = vadd.f32 %v352_v42, %v220_v38  ;;  %v361_v38 = vmul.f32 %v1845_v56, %v2060_v46  ;;  %v368_v42 = vmul.f32 %v1861_v4, %v2060_v46  ;;  %v369_v10 = vmul.f32 %v1863_v5, %v2060_v46 }
  0x8d   :  { %3136 = vst [vmem:[#allocation49_spill] sm:$0xff] %v2078_v41  ;;  %v367_v41 = vmul.f32 %v1863_v5, %v2062_v7  ;;  %v2142_v60 = vpop.permute.xlu0 %294 }
  0x8e   :  { %v2134_v63 = vadd.f32 %v361_v38, %v229_v17  ;;  %3138 = vst [vmem:[#allocation51_spill] sm:$0xff] %v2142_v60  ;;  %v362_v14 = vmul.f32 %v1843_v55, %v2142_v60  ;;  %v363_v17 = vmul.f32 %v1845_v56, %v2142_v60  ;;  %v354_v38 = vmul.f32 %v1833_v49, %v2142_v60 }
  0x8f   :  { %v2110_v62 = vadd.f32 %v367_v41, %v235_v52  ;;  %v2140_v52 = vpop.permute.xlu1 %75  ;;  %v2146_v41 = vadd.f32 %v375_v58, %v243_v13  ;;  %v355_v55 = vmul.f32 %v1835_v50, %v2142_v60 }
  0x90   :  { %3137 = vst [vmem:[#allocation50_spill] sm:$0xff] %v2140_v52  ;;  %v232_v51 = vadd.f32 %v1904_v30, %v2140_v52  ;;  %v233_v9 = vadd.f32 %v1908_v31, %v2140_v52  ;;  %v224_v13 = vadd.f32 %v1912_v34, %v2140_v52  ;;  %v225_v6 = vadd.f32 %v1916_v35, %v2140_v52  ;;  %v3162_v52 = vld [vmem:[#allocation20_spill] sm:$0xff] }
  0x91   :  { %v426_v56 = vadd.f32 %v362_v14, %v1977_v23  ;;  %v427_v45 = vadd.f32 %v363_v17, %v1980_v29  ;;  %v418_v49 = vadd.f32 %v354_v38, %v1989_v12  ;;  %v419_v50 = vadd.f32 %v355_v55, %v1992_v11  ;;  %v3142_v11 = vld [vmem:[#allocation28_spill] sm:$0xff]  ;;  %v3157_v55 = vld [vmem:[#allocation9_spill] sm:$0xff]  ;;  %v3163_v60 = vld [vmem:[#allocation46_spill] sm:$0xff] }
  0x92   :  { %v2171_v30 = vadd.f32 %v1942_v61, %v232_v51  ;;  %v2174_v31 = vadd.f32 %v1946_v0, %v233_v9  ;;  %v2177_v34 = vadd.f32 %v1950_v1, %v224_v13  ;;  %v2180_v35 = vadd.f32 %v1954_v2, %v225_v6  ;;  %v3152_v51 = vld [vmem:[#allocation30_spill] sm:$0xff]  ;;  %v3155_v6 = vld [vmem:[#allocation15_spill] sm:$0xff] }
  0x93   :  { %v2185_v23 = vadd.f32 %v2004_v44, %v426_v56  ;;  %v2188_v29 = vadd.f32 %v2008_v37, %v427_v45  ;;  %v2190_v61 = vadd.f32 %v368_v42, %v236_v32  ;;  %v2192_v0 = vadd.f32 %v369_v10, %v237_v33  ;;  %v3144_v32 = vld [vmem:[#allocation38_spill] sm:$0xff] }
  0x94   :  { %v2195_v1 = vadd.f32 %v2012_v3, %v418_v49  ;;  %v2198_v2 = vadd.f32 %v2016_v48, %v419_v50  ;;  %v2202_v12 = vmul.f32 %v1896_v26, %v2054_v22  ;;  %v2206_v44 = vmul.f32 %v3142_v11, %v2054_v22  ;;  %v3146_v3 = vld [vmem:[#allocation18_spill] sm:$0xff]  ;;  %v3159_v50 = vld [vmem:[#allocation12_spill] sm:$0xff]  ;;  %v3161_v22 = vld [vmem:[#allocation19_spill] sm:$0xff] }
  0x95   :  { %3139 = vst [vmem:[#allocation52_spill] sm:$0xff] %v2190_v61  ;;  %v2210_v37 = vmul.f32 %v1994_v36, %v2062_v7  ;;  %v2214_v33 = vmul.f32 %v3144_v32, %v2062_v7  ;;  %v3147_v54 = vperm.slane %v3146_v3, 2  ;;  %v3149_v57 = vperm.slane %v3146_v3, 6  ;;  %v2226_v10 = vpop.permute.xlu0 %480  ;;  %v3153_v9 = vld [vmem:[#allocation14_spill] sm:$0xff] }
  0x96   :  { %3140 = vst [vmem:[#allocation53_spill] sm:$0xff] %v2192_v0  ;;  %v2232_v13 = vmul.f32 %v3153_v9, %v3152_v51  ;;  %v2236_v38 = vmul.f32 %v3155_v6, %v3152_v51  ;;  %v3158_v45 = vld [vmem:[#allocation10_spill] sm:$0xff]  ;;  %v546_v14 = vmul.f32 %v3157_v55, %v2226_v10  ;;  %v562_v46 = vmul.f32 %v3161_v22, %v2226_v10 }
  0x97   :  { %3141 = vst [vmem:[#allocation54_spill] sm:$0xff] %v2202_v12  ;;  %v2218_v48 = vperm.slane %v3147_v54, 2  ;;  %v2222_v58 = vperm.slane %v3149_v57, 2  ;;  %v2224_v42 = vpop.permute.xlu1 %485  ;;  %v554_v54 = vmul.f32 %v3159_v50, %v2226_v10  ;;  %v3160_v57 = vld [vmem:[#allocation13_spill] sm:$0xff]  ;;  %v547_v7 = vmul.f32 %v3158_v45, %v2226_v10 }
  0x98   :  { %3143 = vst [vmem:[#allocation28_spill] sm:$0xff] %v2206_v44  ;;  %v548_v56 = vmul.f32 %v3157_v55, %v2224_v42  ;;  %v549_v49 = vmul.f32 %v3158_v45, %v2224_v42  ;;  %v555_v17 = vmul.f32 %v3160_v57, %v2226_v10  ;;  %v563_v6 = vmul.f32 %v3162_v52, %v2226_v10 }
  0x99   :  { %3145 = vst [vmem:[#allocation55_spill] sm:$0xff] %v2214_v33  ;;  %v618_v36 = vadd.f32 %v554_v54, %v2100_v19  ;;  %v610_v4 = vadd.f32 %v546_v14, %v2104_v24  ;;  %v611_v51 = vadd.f32 %v547_v7, %v2106_v39  ;;  %v626_v16 = vadd.f32 %v562_v46, %v2108_v27  ;;  %v3166_v24 = vld [vmem:[#allocation33_spill] sm:$0xff]  ;;  %v3169_v54 = vld [vmem:[#allocation23_spill] sm:$0xff] }
  0x9a   :  { %3148 = vst [vmem:[#allocation56_spill] sm:$0xff] %v2218_v48  ;;  %v612_v9 = vadd.f32 %v548_v56, %v2096_v8  ;;  %v613_v32 = vadd.f32 %v549_v49, %v2098_v20  ;;  %v619_v5 = vadd.f32 %v555_v17, %v2102_v25  ;;  %v627_v15 = vadd.f32 %v563_v6, %v2110_v62  ;;  %v3165_v20 = vld [vmem:[#allocation32_spill] sm:$0xff]  ;;  %v3168_v56 = vld [vmem:[#allocation26_spill] sm:$0xff] }
  0x9b   :  { %3150 = vst [vmem:[#allocation57_spill] sm:$0xff] %v2222_v58  ;;  %v556_v8 = vmul.f32 %v3159_v50, %v2224_v42  ;;  %v557_v19 = vmul.f32 %v3160_v57, %v2224_v42  ;;  %v572_v25 = vmul.f32 %v3165_v20, %v2224_v42  ;;  %v573_v7 = vmul.f32 %v3166_v24, %v2224_v42 }
  0x9c   :  { %3151 = vst [vmem:[#allocation58_spill] sm:$0xff] %v2226_v10  ;;  %v570_v46 = vmul.f32 %v3165_v20, %v2226_v10  ;;  %v571_v62 = vmul.f32 %v3166_v24, %v2226_v10 }
  0x9d   :  { %3154 = vst [vmem:[#allocation59_spill] sm:$0xff] %v2232_v13  ;;  %v3164_v13 = vld [vmem:[#allocation47_spill] sm:$0xff]  ;;  %v2280_v17 = vpop.permute.xlu0 %495 }
  0x9e   :  { %3156 = vst [vmem:[#allocation60_spill] sm:$0xff] %v2236_v38  ;;  %v808_v38 = vadd.f32 %v3163_v60, %v612_v9  ;;  %v809_v44 = vadd.f32 %v3164_v13, %v613_v32  ;;  %v620_v60 = vadd.f32 %v556_v8, %v2132_v59  ;;  %v621_v32 = vadd.f32 %v557_v19, %v2134_v63  ;;  %v3167_v59 = vld [vmem:[#allocation25_spill] sm:$0xff]  ;;  %v3170_v8 = vld [vmem:[#allocation24_spill] sm:$0xff] }
  0x9f   :  { %v2278_v14 = vpop.permute.xlu1 %676  ;;  %v2283_v9 = vadd.f32 %v572_v25, %v2136_v28  ;;  %v2286_v13 = vadd.f32 %v573_v7, %v2138_v47  ;;  %v2289_v6 = vadd.f32 %v570_v46, %v2144_v18  ;;  %v3171_v19 = vld [vmem:[#allocation48_spill] sm:$0xff] }
  0xa0   :  { %v872_v27 = vmax.f32 %v808_v38, 0.0  ;;  %v873_v39 = vmax.f32 %v809_v44, 0.0  ;;  %v2292_v38 = vadd.f32 %v571_v62, %v2146_v41  ;;  %v750_v63 = vmul.f32 %v3167_v59, %v2278_v14 }
  0xa1   :  { %v751_v49 = vmul.f32 %v3168_v56, %v2278_v14  ;;  %v742_v28 = vmul.f32 %v3169_v54, %v2278_v14  ;;  %v743_v47 = vmul.f32 %v3170_v8, %v2278_v14  ;;  %v758_v18 = vmul.f32 %v1896_v26, %v2278_v14 }
  0xa2   :  { %v937_v44 = vadd.f32 %v873_v39, %v872_v27  ;;  %v759_v41 = vmul.f32 %v3142_v11, %v2278_v14  ;;  %v816_v25 = vadd.f32 %v3171_v19, %v620_v60  ;;  %v814_v7 = vadd.f32 %v750_v63, %v618_v36  ;;  %v3172_v27 = vld [vmem:[#allocation49_spill] sm:$0xff] }
  0xa3   :  { %v815_v46 = vadd.f32 %v751_v49, %v619_v5  ;;  %v806_v62 = vadd.f32 %v742_v28, %v610_v4  ;;  %v817_v39 = vadd.f32 %v3172_v27, %v621_v32  ;;  %v807_v24 = vadd.f32 %v743_v47, %v611_v51 }
  0xa4   :  { %938 = vadd.xlane.f32.xlu0 %v937_v44  ;;  %v822_v20 = vadd.f32 %v758_v18, %v626_v16  ;;  %v823_v12 = vadd.f32 %v759_v41, %v627_v15  ;;  %v880_v3 = vmax.f32 %v816_v25, 0.0  ;;  %v878_v58 = vmax.f32 %v814_v7, 0.0 }
  0xa5   :  { %v879_v48 = vmax.f32 %v815_v46, 0.0  ;;  %v870_v10 = vmax.f32 %v806_v62, 0.0  ;;  %v881_v0 = vmax.f32 %v817_v39, 0.0  ;;  %v871_v26 = vmax.f32 %v807_v24, 0.0  ;;  %v2316_v16 = vpop.permute.xlu0 %686 }
  0xa6   :  { %v886_v61 = vmax.f32 %v822_v20, 0.0  ;;  %v887_v33 = vmax.f32 %v823_v12, 0.0  ;;  %v560_v60 = vmul.f32 %v3159_v50, %v2280_v17  ;;  %v561_v4 = vmul.f32 %v3160_v57, %v2280_v17 }
  0xa7   :  { %v946_v44 = vadd.f32 %v879_v48, %v878_v58  ;;  %v949_v36 = vadd.f32 %v881_v0, %v880_v3  ;;  %v552_v5 = vmul.f32 %v3157_v55, %v2280_v17  ;;  %v2314_v15 = vpop.permute.xlu1 %691  ;;  %v934_v51 = vadd.f32 %v871_v26, %v870_v10 }
  0xa8   :  { %v958_v32 = vadd.f32 %v887_v33, %v886_v61  ;;  %v624_v20 = vadd.f32 %v560_v60, %v2171_v30  ;;  %v553_v12 = vmul.f32 %v3158_v45, %v2280_v17  ;;  %v754_v0 = vmul.f32 %v3167_v59, %v2316_v16  ;;  %v3173_v60 = vld [vmem:[#allocation41_spill] sm:$0xff] }
  0xa9   :  { %947 = vadd.xlane.f32.xlu1 %v946_v44  ;;  %v755_v3 = vmul.f32 %v3168_v56, %v2316_v16  ;;  %v625_v48 = vadd.f32 %v561_v4, %v2174_v31  ;;  %v756_v58 = vmul.f32 %v3167_v59, %v2314_v15  ;;  %935 = vadd.xlane.f32.xlu2 %v934_v51  ;;  %v3174_v4 = vld [vmem:[#allocation42_spill] sm:$0xff] }
  0xaa   :  { %v757_v26 = vmul.f32 %v3168_v56, %v2314_v15  ;;  %v616_v30 = vadd.f32 %v552_v5, %v2177_v34  ;;  %v617_v61 = vadd.f32 %v553_v12, %v2180_v35  ;;  %v748_v33 = vmul.f32 %v3169_v54, %v2314_v15  ;;  %v3175_v5 = vld [vmem:[#allocation55_spill] sm:$0xff]  ;;  %v3177_v12 = vld [vmem:[#allocation53_spill] sm:$0xff] }
  0xab   :  { %v818_v10 = vadd.f32 %v754_v0, %v2185_v23  ;;  %v819_v55 = vadd.f32 %v755_v3, %v2188_v29  ;;  %v820_v45 = vadd.f32 %v756_v58, %v624_v20  ;;  %v749_v31 = vmul.f32 %v3170_v8, %v2314_v15  ;;  %v3178_v0 = vld [vmem:[#allocation58_spill] sm:$0xff]  ;;  %v3179_v3 = vld [vmem:[#allocation56_spill] sm:$0xff] }
  0xac   :  { %v821_v50 = vadd.f32 %v757_v26, %v625_v48  ;;  %v812_v57 = vadd.f32 %v748_v33, %v616_v30  ;;  %v746_v24 = vmul.f32 %v3169_v54, %v2316_v16  ;;  %v747_v34 = vmul.f32 %v3170_v8, %v2316_v16  ;;  %v3180_v26 = vld [vmem:[#allocation57_spill] sm:$0xff] }
  0xad   :  { %v882_v35 = vmax.f32 %v818_v10, 0.0  ;;  %v883_v59 = vmax.f32 %v819_v55, 0.0  ;;  %v884_v63 = vmax.f32 %v820_v45, 0.0  ;;  %v813_v56 = vadd.f32 %v749_v31, %v617_v61  ;;  %v3181_v61 = vld [vmem:[#allocation18_spill] sm:$0xff]  ;;  %v3185_v31 = vld [vmem:[#allocation28_spill] sm:$0xff] }
  0xae   :  { %v885_v49 = vmax.f32 %v821_v50, 0.0  ;;  %v876_v23 = vmax.f32 %v812_v57, 0.0  ;;  %v810_v29 = vadd.f32 %v746_v24, %v2195_v1  ;;  %v811_v28 = vadd.f32 %v747_v34, %v2198_v2  ;;  %v3184_v55 = vld [vmem:[#allocation54_spill] sm:$0xff]  ;;  %v3186_v24 = vld [vmem:[#allocation11_spill] sm:$0xff] }
  0xaf   :  { %v952_v47 = vadd.f32 %v883_v59, %v882_v35  ;;  %v877_v18 = vmax.f32 %v813_v56, 0.0  ;;  %v832_v41 = vadd.f32 %v2122_v21, %v2283_v9  ;;  %v833_v54 = vadd.f32 %v2126_v53, %v2286_v13  ;;  %v3187_v34 = vld [vmem:[#allocation59_spill] sm:$0xff]  ;;  %v2383_v59 = vld [vmem:[%s2999_s0 + $0x28] sm:$0xff] }
  0xb0   :  { %v955_v19 = vadd.f32 %v885_v49, %v884_v63  ;;  %v874_v8 = vmax.f32 %v810_v29, 0.0  ;;  %v875_v25 = vmax.f32 %v811_v28, 0.0  ;;  %v766_v7 = vmul.f32 %v1926_v40, %v2278_v14 }
  0xb1   :  { %959 = vadd.xlane.f32.xlu1 %v958_v32  ;;  %953 = vadd.xlane.f32.xlu0 %v952_v47  ;;  %v943_v46 = vadd.f32 %v877_v18, %v876_v23  ;;  %v896_v1 = vmax.f32 %v832_v41, 0.0  ;;  %v897_v62 = vmax.f32 %v833_v54, 0.0  ;;  %v767_v2 = vmul.f32 %v1928_v43, %v2278_v14  ;;  %v3188_v47 = vld [vmem:[#allocation60_spill] sm:$0xff]  ;;  %v3189_v41 = vld [vmem:[#allocation51_spill] sm:$0xff]  ;;  %v3190_v54 = vld [vmem:[#allocation21_spill] sm:$0xff] }
  0xb2   :  { %950 = vadd.xlane.f32.xlu2 %v949_v36  ;;  %v940_v27 = vadd.f32 %v875_v25, %v874_v8  ;;  %v830_v21 = vadd.f32 %v766_v7, %v2289_v6  ;;  %v564_v53 = vmul.f32 %v3161_v22, %v2224_v42  ;;  %v565_v9 = vmul.f32 %v3162_v52, %v2224_v42  ;;  %v3176_v36 = vld [vmem:[#allocation52_spill] sm:$0xff] }
  0xb3   :  { %v973_v13 = vadd.f32 %v897_v62, %v896_v1  ;;  %v831_v39 = vadd.f32 %v767_v2, %v2292_v38  ;;  %v446_v44 = vadd.f32 %v2210_v37, %v3173_v60  ;;  %v447_v51 = vadd.f32 %v3175_v5, %v3174_v4  ;;  %v3191_v1 = vld [vmem:[#allocation22_spill] sm:$0xff] }
  0xb4   :  { %v894_v32 = vmax.f32 %v830_v21, 0.0  ;;  %v628_v20 = vadd.f32 %v564_v53, %v3176_v36  ;;  %v629_v6 = vadd.f32 %v565_v9, %v3177_v12  ;;  %v578_v48 = vmul.f32 %v3179_v3, %v3178_v0  ;;  %v3192_v9 = vld [vmem:[#allocation36_spill] sm:$0xff] }
  0xb5   :  { %v895_v58 = vmax.f32 %v831_v39, 0.0  ;;  %v579_v30 = vmul.f32 %v3180_v26, %v3178_v0  ;;  %v3182_v38 = vperm.slane %v3181_v61, 3  ;;  %v3183_v37 = vperm.slane %v3181_v61, 7  ;;  %v3193_v39 = vld [vmem:[#allocation32_spill] sm:$0xff] }
  0xb6   :  { %v824_v45 = vadd.f32 %v3184_v55, %v628_v20  ;;  %v825_v50 = vadd.f32 %v3185_v31, %v629_v6  ;;  %v642_v57 = vadd.f32 %v578_v48, %v446_v44  ;;  %v246_v35 = vadd.f32 %v3187_v34, %v3186_v24  ;;  %v3194_v44 = vld [vmem:[#allocation33_spill] sm:$0xff]  ;;  %v3195_v20 = vld [vmem:[#allocation30_spill] sm:$0xff]  ;;  %v3197_v6 = vld [vmem:[#allocation8_spill] sm:$0xff] }
  0xb7   :  { %v2370_v33 = vperm.slane %v3182_v38, 3  ;;  %v2374_v10 = vperm.slane %v3183_v37, 3  ;;  %v970_v63 = vadd.f32 %v895_v58, %v894_v32  ;;  %v643_v56 = vadd.f32 %v579_v30, %v447_v51  ;;  %v3198_v61 = vld [vmem:[#allocation16_spill] sm:$0xff]  ;;  %v3199_v37 = vld [vmem:[#allocation17_spill] sm:$0xff] }
  0xb8   :  { %v888_v29 = vmax.f32 %v824_v45, 0.0  ;;  %v889_v28 = vmax.f32 %v825_v50, 0.0  ;;  %v247_v18 = vadd.f32 %v3188_v47, %v3186_v24  ;;  %v378_v8 = vmul.f32 %v3190_v54, %v3189_v41 }
  0xb9   :  { %v774_v49 = vmul.f32 %v2370_v33, %v2278_v14  ;;  %v775_v23 = vmul.f32 %v2374_v10, %v2278_v14  ;;  %956 = vadd.xlane.f32.xlu1 %v955_v19  ;;  %944 = vadd.xlane.f32.xlu0 %v943_v46  ;;  %v379_v62 = vmul.f32 %v3191_v1, %v3189_v41  ;;  %v116_v2 = vperm.slane %v2383_v59, 0 }
  0xba   :  { %941 = vadd.xlane.f32.xlu2 %v940_v27  ;;  %v961_v21 = vadd.f32 %v889_v28, %v888_v29  ;;  %v442_v53 = vadd.f32 %v378_v8, %v246_v35  ;;  %v574_v60 = vmul.f32 %v3193_v39, %v3192_v9  ;;  %v575_v4 = vmul.f32 %v3194_v44, %v3192_v9  ;;  %v3196_v27 = vld [vmem:[#allocation7_spill] sm:$0xff] }
  0xbb   :  { %v838_v25 = vadd.f32 %v774_v49, %v642_v57  ;;  %v839_v7 = vadd.f32 %v775_v23, %v643_v56  ;;  %v443_v19 = vadd.f32 %v379_v62, %v247_v18  ;;  %v770_v46 = vmul.f32 %v1926_v40, %v2316_v16  ;;  %v3200_v56 = vld [vmem:[#allocation27_spill] sm:$0xff]  ;;  %v3201_v18 = vld [vmem:[#allocation34_spill] sm:$0xff] }
  0xbc   :  { %v638_v32 = vadd.f32 %v574_v60, %v442_v53  ;;  %v771_v36 = vmul.f32 %v1928_v43, %v2316_v16  ;;  %v174_v12 = vmul.f32 %v3196_v27, %v3195_v20  ;;  %v175_v48 = vmul.f32 %v3197_v6, %v3195_v20  ;;  %v3203_v53 = vld [vmem:[#allocation37_spill] sm:$0xff] }
  0xbd   :  { %v902_v5 = vmax.f32 %v838_v25, 0.0  ;;  %v903_v51 = vmax.f32 %v839_v7, 0.0  ;;  %v639_v30 = vadd.f32 %v575_v4, %v443_v19  ;;  %v370_v38 = vmul.f32 %v3198_v61, %v3189_v41  ;;  %v3202_v7 = vld [vmem:[#allocation35_spill] sm:$0xff]  ;;  %v3204_v4 = vld [vmem:[#allocation38_spill] sm:$0xff] }
  0xbe   :  { %v371_v55 = vmul.f32 %v3199_v37, %v3189_v41  ;;  %v834_v45 = vadd.f32 %v770_v46, %v638_v32  ;;  %v238_v31 = vadd.f32 %v174_v12, %v3186_v24  ;;  %v239_v50 = vadd.f32 %v175_v48, %v3186_v24 }
  0xbf   :  { %v982_v58 = vadd.f32 %v903_v51, %v902_v5  ;;  %v566_v57 = vmul.f32 %v3161_v22, %v3192_v9  ;;  %v835_v34 = vadd.f32 %v771_v36, %v639_v30  ;;  %v567_v35 = vmul.f32 %v3162_v52, %v3192_v9 }
  0xc0   :  { %v762_v49 = vmul.f32 %v3200_v56, %v2316_v16  ;;  %v763_v23 = vmul.f32 %v3142_v11, %v2316_v16  ;;  %v898_v29 = vmax.f32 %v834_v45, 0.0  ;;  %v434_v28 = vadd.f32 %v370_v38, %v238_v31  ;;  %v3205_v45 = vld [vmem:[#allocation6_spill] sm:$0xff] }
  0xc1   :  { %v435_v47 = vadd.f32 %v371_v55, %v239_v50  ;;  %v190_v8 = vmul.f32 %v3201_v18, %v3195_v20  ;;  %974 = vadd.xlane.f32.xlu1 %v973_v13  ;;  %971 = vadd.xlane.f32.xlu0 %v970_v63  ;;  %v899_v25 = vmax.f32 %v835_v34, 0.0  ;;  %v191_v62 = vmul.f32 %v3202_v7, %v3195_v20  ;;  %v3206_v31 = vld [vmem:[#allocation14_spill] sm:$0xff] }
  0xc2   :  { %v386_v60 = vmul.f32 %v3203_v53, %v3189_v41  ;;  %v387_v5 = vmul.f32 %v3204_v4, %v3189_v41  ;;  %962 = vadd.xlane.f32.xlu2 %v961_v21  ;;  %v630_v51 = vadd.f32 %v566_v57, %v434_v28  ;;  %v582_v32 = vmul.f32 %v3179_v3, %v3192_v9  ;;  %v3207_v57 = vld [vmem:[#allocation15_spill] sm:$0xff] }
  0xc3   :  { %v631_v19 = vadd.f32 %v567_v35, %v435_v47  ;;  %v254_v46 = vadd.f32 %v190_v8, %v3186_v24  ;;  %v976_v13 = vadd.f32 %v899_v25, %v898_v29  ;;  %v255_v63 = vadd.f32 %v191_v62, %v3186_v24  ;;  %v3208_v35 = vld [vmem:[#allocation29_spill] sm:$0xff]  ;;  %v3209_v25 = vld [vmem:[#allocation50_spill] sm:$0xff] }
  0xc4   :  { %v583_v36 = vmul.f32 %v3180_v26, %v3192_v9  ;;  %v778_v12 = vmul.f32 %v2370_v33, %v2316_v16  ;;  %v826_v48 = vadd.f32 %v762_v49, %v630_v51  ;;  %v779_v21 = vmul.f32 %v2374_v10, %v2316_v16 }
  0xc5   :  { %v827_v30 = vadd.f32 %v763_v23, %v631_v19  ;;  %v450_v38 = vadd.f32 %v386_v60, %v254_v46  ;;  %v451_v55 = vadd.f32 %v387_v5, %v255_v63  ;;  %v184_v50 = vmul.f32 %v3206_v31, %v3205_v45 }
  0xc6   :  { %v185_v34 = vmul.f32 %v3207_v57, %v3205_v45  ;;  %v380_v29 = vmul.f32 %v3190_v54, %v3208_v35  ;;  %v890_v28 = vmax.f32 %v826_v48, 0.0  ;;  %v381_v49 = vmul.f32 %v3191_v1, %v3208_v35 }
  0xc7   :  { %v891_v47 = vmax.f32 %v827_v30, 0.0  ;;  %v646_v8 = vadd.f32 %v582_v32, %v450_v38  ;;  %v647_v23 = vadd.f32 %v583_v36, %v451_v55  ;;  %v248_v62 = vadd.f32 %v184_v50, %v3209_v25 }
  0xc8   :  { %v249_v60 = vadd.f32 %v185_v34, %v3209_v25  ;;  %v576_v5 = vmul.f32 %v3193_v39, %v2280_v17  ;;  %v577_v46 = vmul.f32 %v3194_v44, %v2280_v17  ;;  %v772_v54 = vmul.f32 %v1926_v40, %v2314_v15 }
  0xc9   :  { %v964_v51 = vadd.f32 %v891_v47, %v890_v28  ;;  %v842_v19 = vadd.f32 %v778_v12, %v646_v8  ;;  %983 = vadd.xlane.f32.xlu1 %v982_v58  ;;  %977 = vadd.xlane.f32.xlu0 %v976_v13  ;;  %v843_v32 = vadd.f32 %v779_v21, %v647_v23  ;;  %v117_v36 = vperm.slane %v2383_v59, 4 }
  0xca   :  { %v444_v1 = vadd.f32 %v380_v29, %v248_v62  ;;  %v445_v63 = vadd.f32 %v381_v49, %v249_v60  ;;  %v773_v39 = vmul.f32 %v1928_v43, %v2314_v15  ;;  %v176_v12 = vmul.f32 %v3196_v27, %v3205_v45 }
  0xcb   :  { %965 = vadd.xlane.f32.xlu2 %v964_v51  ;;  %v906_v48 = vmax.f32 %v842_v19, 0.0  ;;  %v177_v44 = vmul.f32 %v3197_v6, %v3205_v45  ;;  %v907_v30 = vmax.f32 %v843_v32, 0.0  ;;  %v372_v13 = vmul.f32 %v3198_v61, %v3208_v35 }
  0xcc   :  { %v640_v40 = vadd.f32 %v576_v5, %v444_v1  ;;  %v641_v58 = vadd.f32 %v577_v46, %v445_v63  ;;  %v240_v38 = vadd.f32 %v176_v12, %v3209_v25  ;;  %v373_v55 = vmul.f32 %v3199_v37, %v3208_v35 }
  0xcd   :  { %v241_v21 = vadd.f32 %v177_v44, %v3209_v25  ;;  %v568_v43 = vmul.f32 %v3161_v22, %v2280_v17  ;;  %v988_v27 = vadd.f32 %v907_v30, %v906_v48  ;;  %v569_v6 = vmul.f32 %v3162_v52, %v2280_v17 }
  0xce   :  { %v836_v31 = vadd.f32 %v772_v54, %v640_v40  ;;  %v837_v50 = vadd.f32 %v773_v39, %v641_v58  ;;  %v436_v57 = vadd.f32 %v372_v13, %v240_v38  ;;  %v764_v61 = vmul.f32 %v3200_v56, %v2314_v15  ;;  %v3210_v58 = vld [vmem:[#allocation40_spill] sm:$0xff] }
  0xcf   :  { %v437_v34 = vadd.f32 %v373_v55, %v241_v21  ;;  %v765_v29 = vmul.f32 %v3142_v11, %v2314_v15  ;;  %v192_v37 = vmul.f32 %v3201_v18, %v3205_v45  ;;  %v193_v22 = vmul.f32 %v3202_v7, %v3205_v45 }
  0xd0   :  { %v900_v28 = vmax.f32 %v836_v31, 0.0  ;;  %v901_v47 = vmax.f32 %v837_v50, 0.0  ;;  %v632_v8 = vadd.f32 %v568_v43, %v436_v57  ;;  %v388_v52 = vmul.f32 %v3203_v53, %v3208_v35  ;;  %v3211_v31 = vld [vmem:[#allocation5_spill] sm:$0xff] }
  0xd1   :  { %v633_v49 = vadd.f32 %v569_v6, %v437_v34  ;;  %v389_v23 = vmul.f32 %v3204_v4, %v3208_v35  ;;  %989 = vadd.xlane.f32.xlu1 %v988_v27  ;;  %v256_v11 = vadd.f32 %v192_v37, %v3209_v25  ;;  %v257_v62 = vadd.f32 %v193_v22, %v3209_v25  ;;  %v3212_v34 = vld [vmem:[#allocation44_spill] sm:$0xff] }
  0xd2   :  { %v979_v56 = vadd.f32 %v901_v47, %v900_v28  ;;  %v584_v60 = vmul.f32 %v3179_v3, %v2280_v17  ;;  %v828_v5 = vadd.f32 %v764_v61, %v632_v8  ;;  %v585_v19 = vmul.f32 %v3180_v26, %v2280_v17 }
  0xd3   :  { %v829_v51 = vadd.f32 %v765_v29, %v633_v49  ;;  %v780_v46 = vmul.f32 %v2370_v33, %v2314_v15  ;;  %v452_v54 = vadd.f32 %v388_v52, %v256_v11  ;;  %v453_v32 = vadd.f32 %v389_v23, %v257_v62 }
  0xd4   :  { %980 = vadd.xlane.f32.xlu0 %v979_v56  ;;  %v781_v1 = vmul.f32 %v2374_v10, %v2314_v15  ;;  %v2497_v63 = vperm.slane %v116_v2, 0  ;;  %v892_v48 = vmax.f32 %v828_v5, 0.0  ;;  %v2499_v12 = vperm.slane %v117_v36, 0 }
  0xd5   :  { %v893_v39 = vmax.f32 %v829_v51, 0.0  ;;  %v312_v44 = vperm.slane %v2383_v59, 1  ;;  %v648_v30 = vadd.f32 %v584_v60, %v452_v54  ;;  %v649_v40 = vadd.f32 %v585_v19, %v453_v32  ;;  %v3213_v32 = vld [vmem:[#allocation43_spill] sm:$0xff] }
  0xd6   :  { %v196_v13 = vmul.f32 %v2497_v63, %v3210_v58  ;;  %v313_v38 = vperm.slane %v2383_v59, 5  ;;  %v197_v55 = vmul.f32 %v2499_v12, %v3210_v58  ;;  %v508_v2 = vperm.slane %v2383_v59, 2 }
  0xd7   :  { %v967_v21 = vadd.f32 %v893_v39, %v892_v48  ;;  %v2507_v43 = vperm.slane %v312_v44, 1  ;;  %v844_v27 = vadd.f32 %v780_v46, %v648_v30  ;;  %v845_v36 = vadd.f32 %v781_v1, %v649_v40  ;;  %v36_v39 = vld [vmem:[%s2999_s0 + $0x30] sm:$0xff] }
  0xd8   :  { %v260_v50 = vadd.f32 %v196_v13, %v3211_v31  ;;  %v2511_v6 = vperm.slane %v313_v38, 1  ;;  %v261_v57 = vadd.f32 %v197_v55, %v3211_v31  ;;  %v509_v29 = vperm.slane %v2383_v59, 6 }
  0xd9   :  { %968 = vadd.xlane.f32.xlu2 %v967_v21  ;;  %v392_v61 = vmul.f32 %v2507_v43, %v3212_v34  ;;  %v2517_v28 = vperm.slane %v508_v2, 2  ;;  %v908_v47 = vmax.f32 %v844_v27, 0.0  ;;  %v909_v37 = vmax.f32 %v845_v36, 0.0 }
  0xda   :  { %v393_v22 = vmul.f32 %v2511_v6, %v3212_v34  ;;  %v704_v8 = vperm.slane %v2383_v59, 3  ;;  %v2522_v52 = vperm.slane %v509_v29, 2  ;;  %v705_v56 = vperm.slane %v2383_v59, 7 }
  0xdb   :  { %v456_v49 = vadd.f32 %v392_v61, %v260_v50  ;;  %v588_v23 = vmul.f32 %v2517_v28, %v2224_v42  ;;  %v991_v11 = vadd.f32 %v909_v37, %v908_v47  ;;  %v188_v5 = vmul.f32 %v3201_v18, %v3210_v58 }
  0xdc   :  { %v457_v62 = vadd.f32 %v393_v22, %v261_v57  ;;  %v2527_v60 = vperm.slane %v704_v8, 3  ;;  %v589_v51 = vmul.f32 %v2522_v52, %v2224_v42  ;;  %v2533_v46 = vperm.slane %v705_v56, 3 }
  0xdd   :  { %v652_v19 = vadd.f32 %v588_v23, %v456_v49  ;;  %v189_v54 = vmul.f32 %v3202_v7, %v3210_v58  ;;  %992 = vadd.xlane.f32.xlu1 %v991_v11  ;;  %v252_v1 = vadd.f32 %v188_v5, %v3211_v31  ;;  %v384_v48 = vmul.f32 %v3203_v53, %v3212_v34 }
  0xde   :  { %v784_v59 = vmul.f32 %v2527_v60, %v3213_v32  ;;  %v385_v18 = vmul.f32 %v3204_v4, %v3212_v34  ;;  %v653_v44 = vadd.f32 %v589_v51, %v457_v62  ;;  %v785_v7 = vmul.f32 %v2533_v46, %v3213_v32 }
  0xdf   :  { %v253_v30 = vadd.f32 %v189_v54, %v3211_v31  ;;  %v580_v40 = vmul.f32 %v3179_v3, %v2224_v42  ;;  %v448_v38 = vadd.f32 %v384_v48, %v252_v1  ;;  %v581_v53 = vmul.f32 %v3180_v26, %v2224_v42 }
  0xe0   :  { %v848_v13 = vadd.f32 %v784_v59, %v652_v19  ;;  %v776_v4 = vmul.f32 %v2370_v33, %v3213_v32  ;;  %v849_v21 = vadd.f32 %v785_v7, %v653_v44  ;;  %v777_v2 = vmul.f32 %v2374_v10, %v3213_v32 }
  0xe1   :  { %v449_v55 = vadd.f32 %v385_v18, %v253_v30  ;;  %v118_v27 = vperm.slane %v36_v39, 0  ;;  %v644_v50 = vadd.f32 %v580_v40, %v448_v38  ;;  %v119_v57 = vperm.slane %v36_v39, 4  ;;  %v3214_v38 = vld [vmem:[#allocation31_spill] sm:$0xff] }
  0xe2   :  { %v912_v36 = vmax.f32 %v848_v13, 0.0  ;;  %v314_v61 = vperm.slane %v36_v39, 1  ;;  %v913_v29 = vmax.f32 %v849_v21, 0.0  ;;  %v315_v37 = vperm.slane %v36_v39, 5 }
  0xe3   :  { %v645_v3 = vadd.f32 %v581_v53, %v449_v55  ;;  %v2558_v47 = vperm.slane %v118_v27, 0  ;;  %v840_v22 = vadd.f32 %v776_v4, %v644_v50  ;;  %v2560_v26 = vperm.slane %v119_v57, 0  ;;  %v3216_v57 = vld [vmem:[#allocation45_spill] sm:$0xff] }
  0xe4   :  { %v2562_v8 = vperm.slane %v314_v61, 1  ;;  %v510_v33 = vperm.slane %v36_v39, 2  ;;  %v997_v49 = vadd.f32 %v913_v29, %v912_v36  ;;  %v2566_v56 = vperm.slane %v315_v37, 1  ;;  %v3215_v36 = vld [vmem:[#allocation39_spill] sm:$0xff] }
  0xe5   :  { %v841_v23 = vadd.f32 %v777_v2, %v645_v3  ;;  %v204_v10 = vmul.f32 %v2558_v47, %v3210_v58  ;;  %v904_v11 = vmax.f32 %v840_v22, 0.0  ;;  %v205_v62 = vmul.f32 %v2560_v26, %v3210_v58 }
  0xe6   :  { %v400_v5 = vmul.f32 %v2562_v8, %v3212_v34  ;;  %v511_v51 = vperm.slane %v36_v39, 6  ;;  %998 = vadd.xlane.f32.xlu0 %v997_v49  ;;  %v401_v59 = vmul.f32 %v2566_v56, %v3212_v34  ;;  %v2575_v1 = vperm.slane %v510_v33, 2 }
  0xe7   :  { %v905_v19 = vmax.f32 %v841_v23, 0.0  ;;  %v268_v54 = vadd.f32 %v204_v10, %v3211_v31  ;;  %v269_v48 = vadd.f32 %v205_v62, %v3211_v31  ;;  %v706_v44 = vperm.slane %v36_v39, 3 }
  0xe8   :  { %v2578_v18 = vperm.slane %v511_v51, 2  ;;  %v707_v7 = vperm.slane %v36_v39, 7  ;;  %v596_v13 = vmul.f32 %v2575_v1, %v2224_v42  ;;  %v202_v53 = vmul.f32 %v2558_v47, %v3214_v38 }
  0xe9   :  { %v985_v30 = vadd.f32 %v905_v19, %v904_v11  ;;  %v464_v40 = vadd.f32 %v400_v5, %v268_v54  ;;  %v465_v4 = vadd.f32 %v401_v59, %v269_v48  ;;  %v2586_v55 = vperm.slane %v706_v44, 3 }
  0xea   :  { %v597_v21 = vmul.f32 %v2578_v18, %v2224_v42  ;;  %v2588_v2 = vperm.slane %v707_v7, 3  ;;  %v203_v39 = vmul.f32 %v2560_v26, %v3214_v38  ;;  %v266_v50 = vadd.f32 %v202_v53, %v3215_v36 }
  0xeb   :  { %986 = vadd.xlane.f32.xlu2 %v985_v30  ;;  %v660_v27 = vadd.f32 %v596_v13, %v464_v40  ;;  %v398_v61 = vmul.f32 %v2562_v8, %v3216_v57  ;;  %v792_v3 = vmul.f32 %v2586_v55, %v3213_v32  ;;  %v399_v22 = vmul.f32 %v2566_v56, %v3216_v57 }
  0xec   :  { %v661_v29 = vadd.f32 %v597_v21, %v465_v4  ;;  %v793_v37 = vmul.f32 %v2588_v2, %v3213_v32  ;;  %v267_v33 = vadd.f32 %v203_v39, %v3215_v36  ;;  %v594_v23 = vmul.f32 %v2575_v1, %v3178_v0 }
  0xed   :  { %v462_v49 = vadd.f32 %v398_v61, %v266_v50  ;;  %v595_v10 = vmul.f32 %v2578_v18, %v3178_v0  ;;  %v856_v11 = vadd.f32 %v792_v3, %v660_v27  ;;  %v790_v5 = vmul.f32 %v2586_v55, %v2278_v14  ;;  %v37_v27 = vld [vmem:[%s2999_s0 + $0x38] sm:$0xff] }
  0xee   :  { %v857_v62 = vadd.f32 %v793_v37, %v661_v29  ;;  %v791_v51 = vmul.f32 %v2588_v2, %v2278_v14  ;;  %v463_v19 = vadd.f32 %v399_v22, %v267_v33  ;;  %v194_v59 = vmul.f32 %v2497_v63, %v3214_v38 }
  0xef   :  { %v658_v54 = vadd.f32 %v594_v23, %v462_v49  ;;  %v195_v48 = vmul.f32 %v2499_v12, %v3214_v38  ;;  %v920_v44 = vmax.f32 %v856_v11, 0.0  ;;  %v390_v30 = vmul.f32 %v2507_v43, %v3216_v57 }
  0xf0   :  { %v921_v7 = vmax.f32 %v857_v62, 0.0  ;;  %v391_v40 = vmul.f32 %v2511_v6, %v3216_v57  ;;  %v659_v13 = vadd.f32 %v595_v10, %v463_v19  ;;  %v258_v4 = vadd.f32 %v194_v59, %v3215_v36 }
  0xf1   :  { %v854_v53 = vadd.f32 %v790_v5, %v658_v54  ;;  %v259_v21 = vadd.f32 %v195_v48, %v3215_v36  ;;  %v586_v50 = vmul.f32 %v2517_v28, %v3178_v0  ;;  %v587_v61 = vmul.f32 %v2522_v52, %v3178_v0 }
  0xf2   :  { %v1009_v39 = vadd.f32 %v921_v7, %v920_v44  ;;  %v782_v29 = vmul.f32 %v2527_v60, %v2278_v14  ;;  %v855_v3 = vadd.f32 %v791_v51, %v659_v13  ;;  %v454_v22 = vadd.f32 %v390_v30, %v258_v4 }
  0xf3   :  { %v918_v37 = vmax.f32 %v854_v53, 0.0  ;;  %v455_v33 = vadd.f32 %v391_v40, %v259_v21  ;;  %v783_v49 = vmul.f32 %v2533_v46, %v2278_v14  ;;  %v120_v23 = vperm.slane %v37_v27, 0 }
  0xf4   :  { %1010 = vadd.xlane.f32.xlu1 %v1009_v39  ;;  %v121_v10 = vperm.slane %v37_v27, 4  ;;  %v316_v11 = vperm.slane %v37_v27, 1  ;;  %v919_v62 = vmax.f32 %v855_v3, 0.0  ;;  %v650_v5 = vadd.f32 %v586_v50, %v454_v22 }
  0xf5   :  { %v651_v19 = vadd.f32 %v587_v61, %v455_v33  ;;  %v317_v54 = vperm.slane %v37_v27, 5  ;;  %v2631_v59 = vperm.slane %v120_v23, 0  ;;  %v512_v51 = vperm.slane %v37_v27, 2 }
  0xf6   :  { %v2633_v48 = vperm.slane %v121_v10, 0  ;;  %v2635_v44 = vperm.slane %v316_v11, 1  ;;  %v1006_v7 = vadd.f32 %v919_v62, %v918_v37  ;;  %v846_v30 = vadd.f32 %v782_v29, %v650_v5 }
  0xf7   :  { %v847_v40 = vadd.f32 %v783_v49, %v651_v19  ;;  %v2637_v13 = vperm.slane %v317_v54, 1  ;;  %v210_v53 = vmul.f32 %v2631_v59, %v3214_v38  ;;  %v513_v39 = vperm.slane %v37_v27, 6 }
  0xf8   :  { %v211_v4 = vmul.f32 %v2633_v48, %v3214_v38  ;;  %v406_v21 = vmul.f32 %v2635_v44, %v3216_v57  ;;  %1007 = vadd.xlane.f32.xlu0 %v1006_v7  ;;  %v910_v50 = vmax.f32 %v846_v30, 0.0  ;;  %v2647_v29 = vperm.slane %v512_v51, 2 }
  0xf9   :  { %v911_v61 = vmax.f32 %v847_v40, 0.0  ;;  %v407_v3 = vmul.f32 %v2637_v13, %v3216_v57  ;;  %v274_v37 = vadd.f32 %v210_v53, %v3215_v36  ;;  %v2651_v33 = vperm.slane %v513_v39, 2 }
  0xfa   :  { %v275_v22 = vadd.f32 %v211_v4, %v3215_v36  ;;  %v708_v49 = vperm.slane %v37_v27, 3  ;;  %v602_v23 = vmul.f32 %v2647_v29, %v3178_v0  ;;  %v709_v10 = vperm.slane %v37_v27, 7 }
  0xfb   :  { %v994_v38 = vadd.f32 %v911_v61, %v910_v50  ;;  %v206_v11 = vmul.f32 %v2558_v47, %v3195_v20  ;;  %v470_v62 = vadd.f32 %v406_v21, %v274_v37  ;;  %v603_v57 = vmul.f32 %v2651_v33, %v3178_v0 }
  0xfc   :  { %v471_v5 = vadd.f32 %v407_v3, %v275_v22  ;;  %v2659_v19 = vperm.slane %v708_v49, 3  ;;  %v2661_v36 = vperm.slane %v709_v10, 3  ;;  %v207_v54 = vmul.f32 %v2560_v26, %v3195_v20 }
  0xfd   :  { %995 = vadd.xlane.f32.xlu2 %v994_v38  ;;  %v270_v51 = vadd.f32 %v206_v11, %v3186_v24  ;;  %v402_v27 = vmul.f32 %v2562_v8, %v3189_v41  ;;  %v666_v7 = vadd.f32 %v602_v23, %v470_v62  ;;  %v403_v0 = vmul.f32 %v2566_v56, %v3189_v41 }
  0xfe   :  { %v667_v30 = vadd.f32 %v603_v57, %v471_v5  ;;  %v798_v40 = vmul.f32 %v2659_v19, %v2278_v14  ;;  %v799_v53 = vmul.f32 %v2661_v36, %v2278_v14  ;;  %v271_v4 = vadd.f32 %v207_v54, %v3186_v24 }
  0xff   :  { %v466_v21 = vadd.f32 %v402_v27, %v270_v51  ;;  %v598_v39 = vmul.f32 %v2575_v1, %v3192_v9  ;;  %v599_v61 = vmul.f32 %v2578_v18, %v3192_v9  ;;  %v794_v3 = vmul.f32 %v2586_v55, %v2316_v16 }
 0x100   :  { %v862_v50 = vadd.f32 %v798_v40, %v666_v7  ;;  %v795_v37 = vmul.f32 %v2588_v2, %v2316_v16  ;;  %v863_v22 = vadd.f32 %v799_v53, %v667_v30  ;;  %v467_v49 = vadd.f32 %v403_v0, %v271_v4 }
 0x101   :  { %v662_v38 = vadd.f32 %v598_v39, %v466_v21  ;;  %v198_v14 = vmul.f32 %v2497_v63, %v3195_v20  ;;  %v199_v10 = vmul.f32 %v2499_v12, %v3195_v20  ;;  %v394_v11 = vmul.f32 %v2507_v43, %v3189_v41 }
 0x102   :  { %v926_v23 = vmax.f32 %v862_v50, 0.0  ;;  %v395_v62 = vmul.f32 %v2511_v6, %v3189_v41  ;;  %v927_v5 = vmax.f32 %v863_v22, 0.0  ;;  %v663_v57 = vadd.f32 %v599_v61, %v467_v49 }
 0x103   :  { %v858_v54 = vadd.f32 %v794_v3, %v662_v38  ;;  %v262_v51 = vadd.f32 %v198_v14, %v3186_v24  ;;  %v263_v27 = vadd.f32 %v199_v10, %v3186_v24  ;;  %v590_v7 = vmul.f32 %v2517_v28, %v3192_v9 }
 0x104   :  { %v591_v30 = vmul.f32 %v2522_v52, %v3192_v9  ;;  %v786_v40 = vmul.f32 %v2527_v60, %v2316_v16  ;;  %v1018_v0 = vadd.f32 %v927_v5, %v926_v23  ;;  %v859_v53 = vadd.f32 %v795_v37, %v663_v57 }
 0x105   :  { %v922_v4 = vmax.f32 %v858_v54, 0.0  ;;  %v458_v21 = vadd.f32 %v394_v11, %v262_v51  ;;  %v459_v39 = vadd.f32 %v395_v62, %v263_v27  ;;  %v787_v50 = vmul.f32 %v2533_v46, %v2316_v16 }
 0x106   :  { %v214_v61 = vmul.f32 %v2631_v59, %v3195_v20  ;;  %v215_v3 = vmul.f32 %v2633_v48, %v3195_v20  ;;  %1019 = vadd.xlane.f32.xlu1 %v1018_v0  ;;  %v923_v22 = vmax.f32 %v859_v53, 0.0  ;;  %v410_v38 = vmul.f32 %v2635_v44, %v3189_v41 }
 0x107   :  { %v654_v49 = vadd.f32 %v590_v7, %v458_v21  ;;  %v411_v37 = vmul.f32 %v2637_v13, %v3189_v41  ;;  %v655_v14 = vadd.f32 %v591_v30, %v459_v39  ;;  %v606_v11 = vmul.f32 %v2647_v29, %v3192_v9 }
 0x108   :  { %v278_v23 = vadd.f32 %v214_v61, %v3186_v24  ;;  %v279_v10 = vadd.f32 %v215_v3, %v3186_v24  ;;  %v1012_v62 = vadd.f32 %v923_v22, %v922_v4  ;;  %v607_v20 = vmul.f32 %v2651_v33, %v3192_v9 }
 0x109   :  { %v850_v5 = vadd.f32 %v786_v40, %v654_v49  ;;  %v802_v57 = vmul.f32 %v2659_v19, %v2316_v16  ;;  %v851_v54 = vadd.f32 %v787_v50, %v655_v14  ;;  %v803_v41 = vmul.f32 %v2661_v36, %v2316_v16 }
 0x10a   :  { %v474_v51 = vadd.f32 %v410_v38, %v278_v23  ;;  %v475_v27 = vadd.f32 %v411_v37, %v279_v10  ;;  %1013 = vadd.xlane.f32.xlu0 %v1012_v62  ;;  %v208_v24 = vmul.f32 %v2558_v47, %v3205_v45  ;;  %v209_v30 = vmul.f32 %v2560_v26, %v3205_v45 }
 0x10b   :  { %v914_v7 = vmax.f32 %v850_v5, 0.0  ;;  %v404_v9 = vmul.f32 %v2562_v8, %v3208_v35  ;;  %v915_v40 = vmax.f32 %v851_v54, 0.0  ;;  %v405_v4 = vmul.f32 %v2566_v56, %v3208_v35 }
 0x10c   :  { %v670_v0 = vadd.f32 %v606_v11, %v474_v51  ;;  %v671_v53 = vadd.f32 %v607_v20, %v475_v27  ;;  %v272_v21 = vadd.f32 %v208_v24, %v3209_v25  ;;  %v273_v16 = vadd.f32 %v209_v30, %v3209_v25 }
 0x10d   :  { %v600_v39 = vmul.f32 %v2575_v1, %v2280_v17  ;;  %v601_v47 = vmul.f32 %v2578_v18, %v2280_v17  ;;  %v1000_v26 = vadd.f32 %v915_v40, %v914_v7  ;;  %v796_v8 = vmul.f32 %v2586_v55, %v2314_v15 }
 0x10e   :  { %v866_v50 = vadd.f32 %v802_v57, %v670_v0  ;;  %v867_v61 = vadd.f32 %v803_v41, %v671_v53  ;;  %v468_v3 = vadd.f32 %v404_v9, %v272_v21  ;;  %v469_v22 = vadd.f32 %v405_v4, %v273_v16 }
 0x10f   :  { %v797_v56 = vmul.f32 %v2588_v2, %v2314_v15  ;;  %v200_v49 = vmul.f32 %v2497_v63, %v3205_v45  ;;  %1001 = vadd.xlane.f32.xlu2 %v1000_v26  ;;  %v201_v18 = vmul.f32 %v2499_v12, %v3205_v45  ;;  %v396_v37 = vmul.f32 %v2507_v43, %v3208_v35 }
 0x110   :  { %v930_v38 = vmax.f32 %v866_v50, 0.0  ;;  %v931_v1 = vmax.f32 %v867_v61, 0.0  ;;  %v664_v14 = vadd.f32 %v600_v39, %v468_v3  ;;  %v665_v23 = vadd.f32 %v601_v47, %v469_v22 }
 0x111   :  { %v264_v55 = vadd.f32 %v200_v49, %v3209_v25  ;;  %v397_v10 = vmul.f32 %v2511_v6, %v3208_v35  ;;  %v265_v11 = vadd.f32 %v201_v18, %v3209_v25  ;;  %v592_v63 = vmul.f32 %v2517_v28, %v2280_v17 }
 0x112   :  { %v1024_v2 = vadd.f32 %v931_v1, %v930_v38  ;;  %v593_v62 = vmul.f32 %v2522_v52, %v2280_v17  ;;  %v860_v12 = vadd.f32 %v796_v8, %v664_v14  ;;  %v861_v5 = vadd.f32 %v797_v56, %v665_v23 }
 0x113   :  { %v460_v20 = vadd.f32 %v396_v37, %v264_v55  ;;  %v788_v43 = vmul.f32 %v2527_v60, %v2314_v15  ;;  %v461_v57 = vadd.f32 %v397_v10, %v265_v11  ;;  %v789_v6 = vmul.f32 %v2533_v46, %v2314_v15 }
 0x114   :  { %1025 = vadd.xlane.f32.xlu1 %v1024_v2  ;;  %v212_v54 = vmul.f32 %v2631_v59, %v3210_v58  ;;  %v213_v28 = vmul.f32 %v2633_v48, %v3210_v58  ;;  %v924_v51 = vmax.f32 %v860_v12, 0.0  ;;  %v925_v27 = vmax.f32 %v861_v5, 0.0 }
 0x115   :  { %v656_v52 = vadd.f32 %v592_v63, %v460_v20  ;;  %v408_v41 = vmul.f32 %v2635_v44, %v3212_v34  ;;  %v657_v7 = vadd.f32 %v593_v62, %v461_v57  ;;  %v409_v46 = vmul.f32 %v2637_v13, %v3212_v34 }
 0x116   :  { %v276_v60 = vadd.f32 %v212_v54, %v3211_v31  ;;  %v277_v24 = vadd.f32 %v213_v28, %v3211_v31  ;;  %v1015_v30 = vadd.f32 %v925_v27, %v924_v51  ;;  %v604_v40 = vmul.f32 %v2647_v29, %v2224_v42 }
 0x117   :  { %v852_v9 = vadd.f32 %v788_v43, %v656_v52  ;;  %v605_v58 = vmul.f32 %v2651_v33, %v2224_v42  ;;  %v853_v0 = vadd.f32 %v789_v6, %v657_v7  ;;  %v800_v16 = vmul.f32 %v2659_v19, %v3213_v32 }
 0x118   :  { %v472_v53 = vadd.f32 %v408_v41, %v276_v60  ;;  %v473_v4 = vadd.f32 %v409_v46, %v277_v24  ;;  %1016 = vadd.xlane.f32.xlu0 %v1015_v30  ;;  %v216_v31 = vmul.f32 %v2631_v59, %v3205_v45  ;;  %v217_v34 = vmul.f32 %v2633_v48, %v3205_v45  ;;  %v939_v45 = vpop.xlane.xlu0 %938 }
 0x119   :  { %v916_v21 = vmax.f32 %v852_v9, 0.0  ;;  %v917_v39 = vmax.f32 %v853_v0, 0.0  ;;  %v801_v42 = vmul.f32 %v2661_v36, %v3213_v32  ;;  %v412_v56 = vmul.f32 %v2635_v44, %v3208_v35 }
 0x11a   :  { %v668_v47 = vadd.f32 %v604_v40, %v472_v53  ;;  %v669_v26 = vadd.f32 %v605_v58, %v473_v4  ;;  %v280_v50 = vadd.f32 %v216_v31, %v3209_v25  ;;  %v281_v61 = vadd.f32 %v217_v34, %v3209_v25 }
 0x11b   :  { %v1003_v8 = vadd.f32 %v917_v39, %v916_v21  ;;  %v413_v59 = vmul.f32 %v2637_v13, %v3208_v35  ;;  %v608_v49 = vmul.f32 %v2647_v29, %v2280_v17  ;;  %v609_v32 = vmul.f32 %v2651_v33, %v2280_v17 }
 0x11c   :  { %v864_v3 = vadd.f32 %v800_v16, %v668_v47  ;;  %v865_v22 = vadd.f32 %v801_v42, %v669_v26  ;;  %v948_v48 = vpop.xlane.xlu1 %947  ;;  %v936_v38 = vpop.xlane.xlu2 %935  ;;  %v476_v25 = vadd.f32 %v412_v56, %v280_v50  ;;  %v1680_v18 = vmov 256.0  }
 0x11d   :  { %1004 = vadd.xlane.f32.xlu2 %v1003_v8  ;;  %v477_v1 = vadd.f32 %v413_v59, %v281_v61  ;;  %1603 = vrcp.f32 %v1680_v18  ;;  %v804_v44 = vmul.f32 %v2659_v19, %v2314_v15  ;;  %v805_v35 = vmul.f32 %v2661_v36, %v2314_v15 }
 0x11e   :  { %v928_v37 = vmax.f32 %v864_v3, 0.0  ;;  %v929_v14 = vmax.f32 %v865_v22, 0.0  ;;  %v672_v13 = vadd.f32 %v608_v49, %v476_v25  ;;  %v1109_v17 = vlaneseq }
 0x11f   :  { %v673_v23 = vadd.f32 %v609_v32, %v477_v1 }
 0x120   :  { %v1021_v55 = vadd.f32 %v929_v14, %v928_v37  ;;  %v868_v29 = vadd.f32 %v804_v44, %v672_v13  ;;  %v2793_v19 = vand.u32 127, %v1109_v17  ;;  %v1072_v14 = vld [vmem:[%s3002_s3 + $0x18] sm:$0xff]  ;;  %v1070_v13 = vld [vmem:[%s3002_s3 + $0x8] sm:$0xff] }
 0x121   :  { %v869_v10 = vadd.f32 %v805_v35, %v673_v23  ;;  %1202 = vmatpush.msra.mxu0 %v1072_v14  ;;  %v1071_v35 = vld [vmem:[%s3002_s3 + $0x10] sm:$0xff]  ;;  %v1069_v23 = vld [vmem:[%s3002_s3] sm:$0xff] }
 0x122   :  { %v932_v12 = vmax.f32 %v868_v29, 0.0  ;;  %v2796_v57 = vadd.s32 4294967288, %v2793_v19  ;;  %v2801_v51 = vadd.s32 4294967280, %v2793_v19  ;;  %v2804_v27 = vadd.s32 4294967272, %v2793_v19 }
 0x123   :  { %v1604_v2 = vpop.eup %1603  ;;  %v933_v5 = vmax.f32 %v869_v10, 0.0  ;;  %1203 = vmatpush.msra.mxu0 %v1071_v35  ;;  %vm1375_vm14 = vcmp.lt.s32.totalorder %v2793_v19, 8 }
 0x124   :  { %v2791_v33 = vpop.xlane.xlu1 %959  ;;  %v954_v11 = vpop.xlane.xlu0 %953  ;;  %v1031_v63 = vmul.f32 256.0, %v1604_v2  ;;  %vm1035_vm0 = vweird.f32 %v1604_v2 }
 0x125   :  { %1022 = vadd.xlane.f32.xlu2 %v1021_v55  ;;  %v951_v62 = vpop.xlane.xlu2 %950  ;;  %v1027_v15 = vadd.f32 %v933_v5, %v932_v12  ;;  %1204 = vmatpush.msra.mxu0 %v1070_v13 }
 0x126   :  { %v1032_v20 = vsub.f32 1.0, %v1031_v63 }
 0x127   :  { %1205 = vmatpush.msra.mxu0 %v1069_v23 }
 0x128   :  { %v1033_v43 = vmul.f32 %v1604_v2, %v1032_v20 }
 0x12a   :  { %v1034_v36 = vadd.f32 %v1604_v2, %v1033_v43 }
 0x12c   :  { %v957_v6 = vpop.xlane.xlu1 %956  ;;  %v945_v54 = vpop.xlane.xlu0 %944  ;;  %v2798_v28 = vsel %vm1035_vm0, %v1604_v2, %v1034_v36 }
 0x12d   :  { %1028 = vadd.xlane.f32.xlu2 %v1027_v15  ;;  %v1038_v52 = vmul.f32 %v2798_v28, %v939_v45  ;;  %v1041_v41 = vmul.f32 %v2798_v28, %v948_v48  ;;  %v1037_v7 = vmul.f32 %v2798_v28, %v936_v38  ;;  %v1043_v60 = vmul.f32 %v2798_v28, %v954_v11  ;;  %v942_v9 = vpop.xlane.xlu2 %941 }
 0x12e   :  { %v1042_v24 = vmul.f32 %v2798_v28, %v951_v62  ;;  %v1044_v46 = vmul.f32 %v2798_v28, %v957_v6  ;;  %v1040_v30 = vmul.f32 %v2798_v28, %v945_v54  ;;  %v1039_v31 = vmul.f32 %v2798_v28, %v942_v9 }
 0x12f   :  { %v1113_v40 = vperm.slane %v1038_v52, %v2796_v57  ;;  %v1111_v58 = vperm.slane %v1037_v7, %v2793_v19  ;;  %v1124_v0 = vperm.slane %v1041_v41, %v2793_v19  ;;  %v1127_v53 = vperm.slane %v1043_v60, %v2801_v51 }
 0x130   :  { %v1125_v4 = vperm.slane %v1042_v24, %v2796_v57  ;;  %v1129_v21 = vperm.slane %v1044_v46, %v2804_v27  ;;  %v1121_v39 = vperm.slane %v1040_v30, %v2804_v27  ;;  %v1117_v26 = vperm.slane %v1039_v31, %v2801_v51 }
 0x131   :  { %v1115_v16 = vsel %vm1114_vm1, %v1113_v40, %v1111_v58  ;;  %v1045_v62 = vmul.f32 %v2798_v28, %v2791_v33 }
 0x132   :  { %v1126_v34 = vsel %vm1114_vm1, %v1125_v4, %v1124_v0  ;;  %v1119_v50 = vsel %vm1118_vm2, %v1117_v26, %v1115_v16 }
 0x133   :  { %v1128_v47 = vsel %vm1118_vm2, %v1127_v53, %v1126_v34  ;;  %v1123_v61 = vsel %vm1122_vm3, %v1121_v39, %v1119_v50  ;;  %v1131_v33 = vperm.slane %v1045_v62, %v2793_v19 }
 0x134   :  { %v1130_v42 = vsel %vm1122_vm3, %v1129_v21, %v1128_v47  ;;  %v972_v22 = vpop.xlane.xlu0 %971  ;;  %v975_v59 = vpop.xlane.xlu1 %974 }
 0x135   :  { %v2828_v8 = vsel %vm1173_vm4, %v1130_v42, %v1123_v61  ;;  %v963_v3 = vpop.xlane.xlu2 %962  ;;  %v1050_v17 = vmul.f32 %v2798_v28, %v975_v59  ;;  %v1049_v11 = vmul.f32 %v2798_v28, %v972_v22 }
 0x136   :  { %v1046_v10 = vmul.f32 %v2798_v28, %v963_v3 }
 0x137   :  { %v1139_v54 = vperm.slane %v1050_v17, %v2796_v57  ;;  %v1138_v52 = vperm.slane %v1049_v11, %v2793_v19 }
 0x138   :  { %v1132_v20 = vperm.slane %v1046_v10, %v2796_v57 }
 0x139   :  { %v1140_v0 = vsel %vm1114_vm1, %v1139_v54, %v1138_v52 }
 0x13a   :  { %v1133_v30 = vsel %vm1114_vm1, %v1132_v20, %v1131_v33 }
 0x13c   :  { %v978_v45 = vpop.xlane.xlu0 %977  ;;  %v984_v49 = vpop.xlane.xlu1 %983 }
 0x13d   :  { %v1053_v43 = vmul.f32 %v2798_v28, %v984_v49  ;;  %v1051_v15 = vmul.f32 %v2798_v28, %v978_v45 }
 0x13e   :  { %v966_v56 = vpop.xlane.xlu2 %965 }
 0x13f   :  { %v1047_v63 = vmul.f32 %v2798_v28, %v966_v56  ;;  %v1145_v9 = vperm.slane %v1053_v43, %v2793_v19  ;;  %v1141_v40 = vperm.slane %v1051_v15, %v2801_v51 }
 0x141   :  { %v1134_v41 = vperm.slane %v1047_v63, %v2801_v51  ;;  %v1142_v22 = vsel %vm1118_vm2, %v1141_v40, %v1140_v0  ;;  %v1320_v40 = vld [vmem:[%s3005_s6] sm:$0xff] }
 0x143   :  { %v1135_v53 = vsel %vm1118_vm2, %v1134_v41, %v1133_v30  ;;  %v1321_v30 = vld [vmem:[%s3005_s6 + $0x8] sm:$0xff] }
 0x144   :  { %v990_v25 = vpop.xlane.xlu1 %989 }
 0x145   :  { %v1055_v24 = vmul.f32 %v2798_v28, %v990_v25 }
 0x147   :  { %v981_v32 = vpop.xlane.xlu0 %980  ;;  %v1148_v26 = vperm.slane %v1055_v24, %v2801_v51  ;;  %v1322_v24 = vld [vmem:[%s3005_s6 + $0x10] sm:$0xff] }
 0x148   :  { %v1052_v7 = vmul.f32 %v2798_v28, %v981_v32 }
 0x14a   :  { %v1143_v16 = vperm.slane %v1052_v7, %v2804_v27 }
 0x14c   :  { %v969_v48 = vpop.xlane.xlu2 %968  ;;  %v1144_v25 = vsel %vm1122_vm3, %v1143_v16, %v1142_v22 }
 0x14d   :  { %v1048_v36 = vmul.f32 %v2798_v28, %v969_v48 }
 0x14f   :  { %v1136_v58 = vperm.slane %v1048_v36, %v2804_v27 }
 0x150   :  { %v993_v37 = vpop.xlane.xlu1 %992 }
 0x151   :  { %v1056_v31 = vmul.f32 %v2798_v28, %v993_v37  ;;  %v1137_v56 = vsel %vm1122_vm3, %v1136_v58, %v1135_v53  ;;  %v1601_v58 = vld [vmem:[%s3004_s5] ss:$0 sm:$0xff] }
 0x159   :  { %v999_v1 = vpop.xlane.xlu0 %998 }
 0x15a   :  { %v1058_v4 = vmul.f32 %v2798_v28, %v999_v1  ;;  %v1150_v1 = vperm.slane %v1056_v31, %v2804_v27 }
 0x15c   :  { %v1153_v48 = vperm.slane %v1058_v4, %v2796_v57 }
 0x15e   :  { %v987_v38 = vpop.xlane.xlu2 %986 }
 0x15f   :  { %v1054_v12 = vmul.f32 %v2798_v28, %v987_v38 }
 0x161   :  { %v1146_v60 = vperm.slane %v1054_v12, %v2796_v57 }
 0x163   :  { %v1147_v34 = vsel %vm1114_vm1, %v1146_v60, %v1145_v9  ;;  %v1213_v9 = vld [vmem:[%s3003_s4] sm:$0xff] }
 0x164   :  { %v1149_v49 = vsel %vm1118_vm2, %v1148_v26, %v1147_v34 }
 0x165   :  { %v1151_v10 = vsel %vm1122_vm3, %v1150_v1, %v1149_v49 }
 0x167   :  { %v1011_v29 = vpop.xlane.xlu1 %1010 }
 0x168   :  { %v1062_v42 = vmul.f32 %v2798_v28, %v1011_v29 }
 0x16a   :  { %v1160_v35 = vperm.slane %v1062_v42, %v2796_v57 }
 0x16b   :  { %v1008_v44 = vpop.xlane.xlu0 %1007 }
 0x16c   :  { %v1061_v50 = vmul.f32 %v2798_v28, %v1008_v44  ;;  %v1176_v44 = vsel %vm1175_vm5, %v1137_v56, %v2828_v8 }
 0x16e   :  { %v1159_v13 = vperm.slane %v1061_v50, %v2793_v19 }
 0x170   :  { %v996_v18 = vpop.xlane.xlu2 %995  ;;  %v1161_v62 = vsel %vm1114_vm1, %v1160_v35, %v1159_v13 }
 0x171   :  { %v1057_v46 = vmul.f32 %v2798_v28, %v996_v18 }
 0x173   :  { %v1152_v61 = vperm.slane %v1057_v46, %v2793_v19  ;;  %v1214_v46 = vld [vmem:[%s3003_s4 + $0x8] sm:$0xff] }
 0x175   :  { %v1154_v23 = vsel %vm1114_vm1, %v1153_v48, %v1152_v61 }
 0x179   :  { %v1020_v6 = vpop.xlane.xlu1 %1019 }
 0x17a   :  { %v1065_v18 = vmul.f32 %v2798_v28, %v1020_v6 }
 0x17c   :  { %v1166_v8 = vperm.slane %v1065_v18, %v2793_v19 }
 0x17d   :  { %v1014_v2 = vpop.xlane.xlu0 %1013 }
 0x17e   :  { %v1063_v59 = vmul.f32 %v2798_v28, %v1014_v2 }
 0x182   :  { %v1002_v55 = vpop.xlane.xlu2 %1001 }
 0x183   :  { %v1059_v21 = vmul.f32 %v2798_v28, %v1002_v55  ;;  %v1162_v55 = vperm.slane %v1063_v59, %v2801_v51 }
 0x185   :  { %v1155_v32 = vperm.slane %v1059_v21, %v2801_v51 }
 0x187   :  { %v1026_v37 = vpop.xlane.xlu1 %1025  ;;  %v1156_v2 = vsel %vm1118_vm2, %v1155_v32, %v1154_v23 }
 0x188   :  { %v1067_v17 = vmul.f32 %v2798_v28, %v1026_v37 }
 0x18a   :  { %v1169_v36 = vperm.slane %v1067_v17, %v2801_v51  ;;  %v1323_v51 = vld [vmem:[%s3005_s6 + $0x18] sm:$0xff] }
 0x18b   :  { %v1017_v39 = vpop.xlane.xlu0 %1016  ;;  %1346 = vmatpush.msrb.mxu0 %v1323_v51  ;;  %1585 = vmatpush.msra.mxu1 %v1323_v51 }
 0x18c   :  { %v1064_v38 = vmul.f32 %v2798_v28, %v1017_v39  ;;  %v2953_v39 = vld [vmem:[%s3006_s7] ss:$0 sm:$0xff]  ;;  %s1681_s7 = smov [#allocation2]  }
 0x18d   :  { %1347 = vmatpush.msrb.mxu0 %v1322_v24  ;;  %1587 = vmatpush.msra.mxu1 %v1322_v24  ;;  %s1548_s13 = sshll.u32 %s1681_s7, 4  ;;  %s1549_s13 = int_to_ptr.vmem [resolvable:$true] %s1548_s13 }
 0x18e   :  { %v1164_v11 = vperm.slane %v1064_v38, %v2804_v27 }
 0x18f   :  { %1348 = vmatpush.msrb.mxu0 %v1321_v30  ;;  %1589 = vmatpush.msra.mxu1 %v1321_v30 }
 0x190   :  { %v1005_v5 = vpop.xlane.xlu2 %1004 }
 0x191   :  { %v1060_v47 = vmul.f32 %v2798_v28, %v1005_v5  ;;  %v1178_v5 = vsel %vm1177_vm6, %v1144_v25, %v1176_v44  ;;  %1349 = vmatpush.msrb.mxu0 %v1320_v40  ;;  %1591 = vmatpush.msra.mxu1 %v1320_v40 }
 0x192   :  { %v1180_v15 = vsel %vm1179_vm7, %v1151_v10, %v1178_v5 }
 0x193   :  { %v1157_v14 = vperm.slane %v1060_v47, %v2804_v27 }
 0x195   :  { %v1158_v63 = vsel %vm1122_vm3, %v1157_v14, %v1156_v2 }
 0x196   :  { %v1182_v54 = vsel %vm1181_vm8, %v1158_v63, %v1180_v15 }
 0x198   :  { %v1023_v3 = vpop.xlane.xlu2 %1022 }
 0x199   :  { %v1066_v45 = vmul.f32 %v2798_v28, %v1023_v3 }
 0x19b   :  { %v1167_v29 = vperm.slane %v1066_v45, %v2796_v57  ;;  %v1163_v57 = vsel %vm1118_vm2, %v1162_v55, %v1161_v62 }
 0x19c   :  { %v1165_v6 = vsel %vm1122_vm3, %v1164_v11, %v1163_v57 }
 0x19d   :  { %v1168_v20 = vsel %vm1114_vm1, %v1167_v29, %v1166_v8  ;;  %v1184_v7 = vsel %vm1183_vm9, %v1165_v6, %v1182_v54 }
 0x19e   :  { %v1170_v41 = vsel %vm1118_vm2, %v1169_v36, %v1168_v20 }
 0x1a0   :  { %v1029_v12 = vpop.xlane.xlu2 %1028 }
 0x1a1   :  { %v1068_v43 = vmul.f32 %v2798_v28, %v1029_v12  ;;  %v1216_v28 = vld [vmem:[%s3003_s4 + $0x18] sm:$0xff] }
 0x1a2   :  { %1241 = vmatpush.msra.mxu2 %v1216_v28  ;;  %1307 = vmatpush.msra.mxu3 %v1216_v28 }
 0x1a3   :  { %v1171_v52 = vperm.slane %v1068_v43, %v2804_v27  ;;  %v1215_v27 = vld [vmem:[%s3003_s4 + $0x10] sm:$0xff] }
 0x1a4   :  { %1242 = vmatpush.msra.mxu2 %v1215_v27  ;;  %1308 = vmatpush.msra.mxu3 %v1215_v27 }
 0x1a5   :  { %v1172_v33 = vsel %vm1122_vm3, %v1171_v52, %v1170_v41 }
 0x1a6   :  { %v1186_v60 = vsel %vm1185_vm10, %v1172_v33, %v1184_v7  ;;  %1243 = vmatpush.msra.mxu2 %v1214_v46  ;;  %1309 = vmatpush.msra.mxu3 %v1214_v46 }
 0x1a7   :  { %1562 = vmatmul.msk.f32.vlgmr.msra.gmra.mxu0 %vm1187_vm11, %v1186_v60 }
 0x1a8   :  { %1244 = vmatpush.msra.mxu2 %v1213_v9  ;;  %1310 = vmatpush.msra.mxu3 %v1213_v9 }
 0x1aa   :  { %1274 = vmatpush.msrb.mxu2 %v1216_v28  ;;  %1586 = vmatpush.msrb.mxu3 %v1323_v51 }
 0x1ac   :  { %1275 = vmatpush.msrb.mxu2 %v1215_v27  ;;  %1588 = vmatpush.msrb.mxu3 %v1322_v24 }
 0x1ae   :  { %1276 = vmatpush.msrb.mxu2 %v1214_v46  ;;  %1590 = vmatpush.msrb.mxu3 %v1321_v30 }
 0x1b0   :  { %1277 = vmatpush.msrb.mxu2 %v1213_v9  ;;  %1592 = vmatpush.msrb.mxu3 %v1320_v40 }
 0x224   :  { %v1207_v0 = vpop.f32.mrf.mxu0 }
 0x225   :  { %v2939_v53 = vadd.f32 %v1601_v58, %v1207_v0 }
 0x227   :  { %v1217_v4 = vperm.slane %v2939_v53, 0  ;;  %v2943_v21 = vrot.slane %v2939_v53, 4  ;;  %v1221_v50 = vperm.slane %v2939_v53, 1  ;;  %v1254_v33 = vperm.slane %v2939_v53, 2 }
 0x229   :  { %1605 = vtanh.f32 %v1217_v4  ;;  %v1218_v16 = vperm.slane %v2943_v21, 0  ;;  %v1222_v49 = vperm.slane %v2943_v21, 1  ;;  %v1255_v30 = vperm.slane %v2943_v21, 2 }
 0x22b   :  { %1607 = vtanh.f32 %v1218_v16 }
 0x22f   :  { %v1606_v31 = vpop.eup %1605 }
 0x230   :  { %1563 = vmatmul.msk.f32.vlgmr.msra.gmra.mxu2 %vm1187_vm11, %v1606_v31  ;;  %1569 = vmatmul.msk.f32.vlgmr.msrb.gmra.mxu0 %vm1187_vm11, %v1606_v31 }
 0x231   :  { %v1608_v34 = vpop.eup %1607 }
 0x238   :  { %1564 = vmatmul.msk.f32.gmra.mxu2 %vm1187_vm11, %v1608_v34  ;;  %1570 = vmatmul.msk.f32.gmra.mxu0 %vm1187_vm11, %v1608_v34 }
 0x2ad   :  { %v1351_v47 = vpop.f32.mrf.mxu0 }
 0x2ae   :  { %v1352_v26 = vadd.f32 %v2953_v39, %v1351_v47 }
 0x2b0   :  { %v1577_v42 = vmul.f32 -1.442695, %v1352_v26 }
 0x2b2   :  { %1609 = vpow2.f32 %v1577_v42 }
 0x2b3   :  { %v1246_v61 = vpop.f32.mrf.mxu2 }
 0x2b4   :  { %v1247_v3 = vadd.f32 %v1246_v61, %v1221_v50 }
 0x2b5   :  { %v1354_v22 = vpop.f32.mrf.mxu0 }
 0x2b6   :  { %1611 = vtanh.f32 %v1247_v3  ;;  %v1355_v56 = vadd.f32 %v2953_v39, %v1354_v22 }
 0x2b8   :  { %v1610_v59 = vpop.eup %1609  ;;  %v1578_v45 = vmul.f32 -1.442695, %v1355_v56 }
 0x2b9   :  { %v1400_v48 = vadd.f32 1.0, %v1610_v59 }
 0x2ba   :  { %1613 = vpow2.f32 %v1578_v45 }
 0x2bb   :  { %1615 = vrcp.f32 %v1400_v48  ;;  %v1249_v32 = vpop.f32.mrf.mxu2  ;;  %v1419_v13 = vand.u32 2147483648, %v1400_v48  ;;  %v1417_v55 = vand.u32 2147483647, %v1400_v48  ;;  %vm1413_vm13 = vweird.f32 %v1400_v48 }
 0x2bc   :  { %v1612_v38 = vpop.eup %1611  ;;  %v1250_v25 = vadd.f32 %v1249_v32, %v1222_v49 }
 0x2bd   :  { %1565 = vmatmul.msk.f32.vlgmr.msrb.gmra.mxu2 %vm1187_vm11, %v1612_v38  ;;  %1571 = vmatmul.msk.f32.gmra.mxu0 %vm1187_vm11, %v1612_v38  ;;  %v1420_v2 = vor.u32 1.1754944e-38, %v1419_v13  ;;  %vm1418_vm0 = vcmp.eq.f32.partialorder %v1417_v55, 8.507059e+37  ;;  %v1287_v55 = vperm.slane %v2939_v53, 3 }
 0x2be   :  { %1617 = vtanh.f32 %v1250_v25 }
 0x2c0   :  { %v1614_v1 = vpop.eup %1613 }
 0x2c1   :  { %v1616_v18 = vpop.eup %1615  ;;  %v1401_v37 = vadd.f32 1.0, %v1614_v1 }
 0x2c2   :  { %v1409_v14 = vmul.f32 %v1616_v18, %v1400_v48  ;;  %vm1414_vm12 = vweird.f32 %v1616_v18 }
 0x2c3   :  { %1619 = vrcp.f32 %v1401_v37  ;;  %vm1415_vm15 = vmor %vm1413_vm13, %vm1414_vm12  ;;  %v1434_v12 = vand.u32 2147483648, %v1401_v37  ;;  %v1432_v57 = vand.u32 2147483647, %v1401_v37  ;;  %vm1428_vm2 = vweird.f32 %v1401_v37 }
 0x2c4   :  { %v1618_v44 = vpop.eup %1617  ;;  %v1410_v35 = vsub.f32 1.0, %v1409_v14 }
 0x2c5   :  { %1566 = vmatmul.msk.f32.gmra.mxu2 %vm1187_vm11, %v1618_v44  ;;  %1572 = vmatmul.msk.f32.vlgmr.msra.gmra.mxu1 %vm1187_vm11, %v1618_v44  ;;  %v1435_v43 = vor.u32 1.1754944e-38, %v1434_v12  ;;  %vm1433_vm4 = vcmp.eq.f32.partialorder %v1432_v57, 8.507059e+37 }
 0x2c6   :  { %v1411_v23 = vmul.f32 %v1616_v18, %v1410_v35 }
 0x2c8   :  { %v1412_v29 = vadd.f32 %v1616_v18, %v1411_v23 }
 0x2c9   :  { %v1620_v10 = vpop.eup %1619 }
 0x2ca   :  { %v1416_v17 = vsel %vm1415_vm15, %v1616_v18, %v1412_v29  ;;  %v1424_v11 = vmul.f32 %v1620_v10, %v1401_v37  ;;  %vm1429_vm1 = vweird.f32 %v1620_v10 }
 0x2cb   :  { %v1421_v8 = vsel %vm1418_vm0, %v1420_v2, %v1416_v17  ;;  %vm1430_vm3 = vmor %vm1428_vm2, %vm1429_vm1 }
 0x2cc   :  { %v1528_v63 = vsel %vm1375_vm14, %v1352_v26, %v1421_v8  ;;  %v1425_v62 = vsub.f32 1.0, %v1424_v11 }
 0x2cd   :  { %1536 = vst [vmem:[#allocation2] sm:$0xff] %v1528_v63 }
 0x2ce   :  { %v1426_v5 = vmul.f32 %v1620_v10, %v1425_v62  ;;  %v1288_v62 = vperm.slane %v2943_v21, 3 }
 0x2d0   :  { %v1427_v20 = vadd.f32 %v1620_v10, %v1426_v5 }
 0x2d2   :  { %v1431_v15 = vsel %vm1430_vm3, %v1620_v10, %v1427_v20 }
 0x2d3   :  { %v1436_v36 = vsel %vm1433_vm4, %v1435_v43, %v1431_v15 }
 0x2d4   :  { %v1529_v6 = vsel %vm1375_vm14, %v1355_v56, %v1436_v36 }
 0x2d5   :  { %1537 = vst [vmem:[#allocation2 + $0x8] sm:$0xff] %v1529_v6 }
 0x33a   :  { %v1357_v54 = vpop.f32.mrf.mxu0 }
 0x33b   :  { %v1358_v52 = vadd.f32 %v2953_v39, %v1357_v54 }
 0x33d   :  { %v1579_v41 = vmul.f32 -1.442695, %v1358_v52 }
 0x33f   :  { %1621 = vpow2.f32 %v1579_v41 }
 0x340   :  { %v1279_v7 = vpop.f32.mrf.mxu2 }
 0x341   :  { %v1280_v60 = vadd.f32 %v1279_v7, %v1254_v33 }
 0x342   :  { %v1360_v28 = vpop.f32.mrf.mxu1 }
 0x343   :  { %1623 = vtanh.f32 %v1280_v60  ;;  %v1361_v51 = vadd.f32 %v2953_v39, %v1360_v28 }
 0x345   :  { %v1622_v27 = vpop.eup %1621  ;;  %v1580_v24 = vmul.f32 -1.442695, %v1361_v51 }
 0x346   :  { %v1402_v46 = vadd.f32 1.0, %v1622_v27 }
 0x347   :  { %1625 = vpow2.f32 %v1580_v24 }
 0x348   :  { %1627 = vrcp.f32 %v1402_v46  ;;  %v1282_v9 = vpop.f32.mrf.mxu2  ;;  %v1449_v26 = vand.u32 2147483648, %v1402_v46  ;;  %v1447_v50 = vand.u32 2147483647, %v1402_v46  ;;  %vm1443_vm6 = vweird.f32 %v1402_v46 }
 0x349   :  { %v1624_v40 = vpop.eup %1623  ;;  %v1283_v58 = vadd.f32 %v1282_v9, %v1255_v30 }
 0x34a   :  { %1567 = vmatmul.msk.f32.vlgmr.msra.gmra.mxu3 %vm1187_vm11, %v1624_v40  ;;  %1573 = vmatmul.msk.f32.gmra.mxu1 %vm1187_vm11, %v1624_v40  ;;  %v1450_v22 = vor.u32 1.1754944e-38, %v1449_v26  ;;  %vm1448_vm8 = vcmp.eq.f32.partialorder %v1447_v50, 8.507059e+37 }
 0x34b   :  { %1629 = vtanh.f32 %v1283_v58 }
 0x34d   :  { %v1626_v0 = vpop.eup %1625 }
 0x34e   :  { %v1628_v4 = vpop.eup %1627  ;;  %v1403_v16 = vadd.f32 1.0, %v1626_v0 }
 0x34f   :  { %v1439_v31 = vmul.f32 %v1628_v4, %v1402_v46  ;;  %vm1444_vm5 = vweird.f32 %v1628_v4 }
 0x350   :  { %1631 = vrcp.f32 %v1403_v16  ;;  %vm1445_vm7 = vmor %vm1443_vm6, %vm1444_vm5  ;;  %v1464_v32 = vand.u32 2147483648, %v1403_v16  ;;  %v1462_v25 = vand.u32 2147483647, %v1403_v16  ;;  %vm1458_vm10 = vweird.f32 %v1403_v16 }
 0x351   :  { %v1630_v34 = vpop.eup %1629  ;;  %v1440_v47 = vsub.f32 1.0, %v1439_v31 }
 0x352   :  { %1568 = vmatmul.msk.f32.gmra.mxu3 %vm1187_vm11, %v1630_v34  ;;  %1574 = vmatmul.msk.f32.gmra.mxu1 %vm1187_vm11, %v1630_v34  ;;  %v1465_v18 = vor.u32 1.1754944e-38, %v1464_v32  ;;  %vm1463_vm13 = vcmp.eq.f32.partialorder %v1462_v25, 8.507059e+37 }
 0x353   :  { %v1441_v42 = vmul.f32 %v1628_v4, %v1440_v47 }
 0x355   :  { %v1442_v61 = vadd.f32 %v1628_v4, %v1441_v42 }
 0x356   :  { %v1632_v3 = vpop.eup %1631 }
 0x357   :  { %v1446_v56 = vsel %vm1445_vm7, %v1628_v4, %v1442_v61  ;;  %v1454_v59 = vmul.f32 %v1632_v3, %v1403_v16  ;;  %vm1459_vm9 = vweird.f32 %v1632_v3 }
 0x358   :  { %v1451_v45 = vsel %vm1448_vm8, %v1450_v22, %v1446_v56  ;;  %vm1460_vm12 = vmor %vm1458_vm10, %vm1459_vm9 }
 0x359   :  { %v1530_v48 = vsel %vm1375_vm14, %v1358_v52, %v1451_v45  ;;  %v1455_v49 = vsub.f32 1.0, %v1454_v59 }
 0x35a   :  { %1538 = vst [vmem:[#allocation2 + $0x10] sm:$0xff] %v1530_v48 }
 0x35b   :  { %v1456_v38 = vmul.f32 %v1632_v3, %v1455_v49 }
 0x35d   :  { %v1457_v1 = vadd.f32 %v1632_v3, %v1456_v38 }
 0x35f   :  { %v1461_v37 = vsel %vm1460_vm12, %v1632_v3, %v1457_v1 }
 0x360   :  { %v1466_v14 = vsel %vm1463_vm13, %v1465_v18, %v1461_v37 }
 0x361   :  { %v1531_v44 = vsel %vm1375_vm14, %v1361_v51, %v1466_v14 }
 0x362   :  { %1539 = vst [vmem:[#allocation2 + $0x18] sm:$0xff] %v1531_v44 }
 0x3c7   :  { %v1363_v35 = vpop.f32.mrf.mxu1 }
 0x3c8   :  { %v1364_v13 = vadd.f32 %v2953_v39, %v1363_v35 }
 0x3ca   :  { %v1581_v23 = vmul.f32 -1.442695, %v1364_v13 }
 0x3cc   :  { %1633 = vpow2.f32 %v1581_v23 }
 0x3cd   :  { %v1312_v29 = vpop.f32.mrf.mxu3 }
 0x3ce   :  { %v1313_v10 = vadd.f32 %v1312_v29, %v1287_v55 }
 0x3cf   :  { %v1366_v2 = vpop.f32.mrf.mxu1 }
 0x3d0   :  { %1635 = vtanh.f32 %v1313_v10  ;;  %v1367_v17 = vadd.f32 %v2953_v39, %v1366_v2 }
 0x3d2   :  { %v1634_v11 = vpop.eup %1633  ;;  %v1582_v8 = vmul.f32 -1.442695, %v1367_v17 }
 0x3d3   :  { %v1404_v63 = vadd.f32 1.0, %v1634_v11 }
 0x3d4   :  { %1637 = vpow2.f32 %v1582_v8 }
 0x3d5   :  { %1639 = vrcp.f32 %v1404_v63  ;;  %v1315_v12 = vpop.f32.mrf.mxu3  ;;  %v1479_v54 = vand.u32 2147483648, %v1404_v63  ;;  %v1477_v21 = vand.u32 2147483647, %v1404_v63  ;;  %vm1473_vm0 = vweird.f32 %v1404_v63 }
 0x3d6   :  { %v1636_v5 = vpop.eup %1635  ;;  %v1316_v57 = vadd.f32 %v1315_v12, %v1288_v62 }
 0x3d7   :  { %1575 = vmatmul.msk.f32.gmra.mxu1 %vm1187_vm11, %v1636_v5  ;;  %v1480_v7 = vor.u32 1.1754944e-38, %v1479_v54  ;;  %vm1478_vm2 = vcmp.eq.f32.partialorder %v1477_v21, 8.507059e+37 }
 0x3d8   :  { %1641 = vtanh.f32 %v1316_v57 }
 0x3da   :  { %v1638_v53 = vpop.eup %1637 }
 0x3db   :  { %v1640_v20 = vpop.eup %1639  ;;  %v1405_v43 = vadd.f32 1.0, %v1638_v53 }
 0x3dc   :  { %v1469_v15 = vmul.f32 %v1640_v20, %v1404_v63  ;;  %vm1474_vm15 = vweird.f32 %v1640_v20 }
 0x3dd   :  { %1643 = vrcp.f32 %v1405_v43  ;;  %vm1475_vm1 = vmor %vm1473_vm0, %vm1474_vm15  ;;  %v1494_v46 = vand.u32 2147483648, %v1405_v43  ;;  %v1492_v9 = vand.u32 2147483647, %v1405_v43  ;;  %vm1488_vm3 = vweird.f32 %v1405_v43 }
 0x3de   :  { %v1642_v36 = vpop.eup %1641  ;;  %v1470_v6 = vsub.f32 1.0, %v1469_v15 }
 0x3df   :  { %1576 = vmatmul.msk.f32.vlgmr.msrb.gmra.mxu3 %vm1187_vm11, %v1642_v36  ;;  %v1495_v58 = vor.u32 1.1754944e-38, %v1494_v46  ;;  %vm1493_vm5 = vcmp.eq.f32.partialorder %v1492_v9, 8.507059e+37 }
 0x3e0   :  { %v1471_v52 = vmul.f32 %v1640_v20, %v1470_v6 }
 0x3e2   :  { %v1472_v41 = vadd.f32 %v1640_v20, %v1471_v52 }
 0x3e3   :  { %v1644_v33 = vpop.eup %1643 }
 0x3e4   :  { %v1476_v60 = vsel %vm1475_vm1, %v1640_v20, %v1472_v41  ;;  %v1484_v28 = vmul.f32 %v1644_v33, %v1405_v43  ;;  %vm1489_vm11 = vweird.f32 %v1644_v33 }
 0x3e5   :  { %v1481_v51 = vsel %vm1478_vm2, %v1480_v7, %v1476_v60  ;;  %vm1490_vm4 = vmor %vm1488_vm3, %vm1489_vm11 }
 0x3e6   :  { %v1532_v27 = vsel %vm1375_vm14, %v1364_v13, %v1481_v51  ;;  %v1485_v24 = vsub.f32 1.0, %v1484_v28 }
 0x3e7   :  { %1540 = vst [vmem:[#allocation2 + $0x20] sm:$0xff] %v1532_v27 }
 0x3e8   :  { %v1486_v30 = vmul.f32 %v1644_v33, %v1485_v24 }
 0x3ea   :  { %v1487_v40 = vadd.f32 %v1644_v33, %v1486_v30 }
 0x3ec   :  { %v1491_v0 = vsel %vm1490_vm4, %v1644_v33, %v1487_v40 }
 0x3ed   :  { %v1496_v4 = vsel %vm1493_vm5, %v1495_v58, %v1491_v0 }
 0x3ee   :  { %v1533_v16 = vsel %vm1375_vm14, %v1367_v17, %v1496_v4 }
 0x3ef   :  { %1541 = vst [vmem:[#allocation2 + $0x28] sm:$0xff] %v1533_v16 }
 0x454   :  { %v1369_v31 = vpop.f32.mrf.mxu1 }
 0x455   :  { %v1370_v34 = vadd.f32 %v2953_v39, %v1369_v31 }
 0x457   :  { %v1583_v47 = vmul.f32 -1.442695, %v1370_v34 }
 0x459   :  { %1645 = vpow2.f32 %v1583_v47 }
 0x45f   :  { %v1646_v26 = vpop.eup %1645 }
 0x460   :  { %v1406_v42 = vadd.f32 1.0, %v1646_v26 }
 0x462   :  { %1647 = vrcp.f32 %v1406_v42  ;;  %v1372_v50 = vpop.f32.mrf.mxu3  ;;  %v1509_v45 = vand.u32 2147483648, %v1406_v42  ;;  %v1507_v32 = vand.u32 2147483647, %v1406_v42  ;;  %vm1503_vm7 = vweird.f32 %v1406_v42 }
 0x463   :  { %v1373_v61 = vadd.f32 %v2953_v39, %v1372_v50 }
 0x464   :  { %v1510_v1 = vor.u32 1.1754944e-38, %v1509_v45  ;;  %vm1508_vm9 = vcmp.eq.f32.partialorder %v1507_v32, 8.507059e+37 }
 0x465   :  { %v1584_v3 = vmul.f32 -1.442695, %v1373_v61 }
 0x467   :  { %1649 = vpow2.f32 %v1584_v3 }
 0x468   :  { %v1648_v22 = vpop.eup %1647 }
 0x469   :  { %v1499_v56 = vmul.f32 %v1648_v22, %v1406_v42  ;;  %vm1504_vm6 = vweird.f32 %v1648_v22 }
 0x46a   :  { %vm1505_vm8 = vmor %vm1503_vm7, %vm1504_vm6 }
 0x46b   :  { %v1500_v59 = vsub.f32 1.0, %v1499_v56 }
 0x46d   :  { %v1650_v48 = vpop.eup %1649  ;;  %v1501_v49 = vmul.f32 %v1648_v22, %v1500_v59 }
 0x46e   :  { %v1407_v38 = vadd.f32 1.0, %v1650_v48 }
 0x46f   :  { %v1502_v25 = vadd.f32 %v1648_v22, %v1501_v49 }
 0x470   :  { %1651 = vrcp.f32 %v1407_v38  ;;  %v1524_v13 = vand.u32 2147483648, %v1407_v38  ;;  %v1522_v55 = vand.u32 2147483647, %v1407_v38  ;;  %vm1518_vm12 = vweird.f32 %v1407_v38 }
 0x471   :  { %v1506_v18 = vsel %vm1505_vm8, %v1648_v22, %v1502_v25 }
 0x472   :  { %v1511_v37 = vsel %vm1508_vm9, %v1510_v1, %v1506_v18  ;;  %v1525_v10 = vor.u32 1.1754944e-38, %v1524_v13  ;;  %vm1523_vm15 = vcmp.eq.f32.partialorder %v1522_v55, 8.507059e+37 }
 0x473   :  { %v1534_v39 = vsel %vm1375_vm14, %v1370_v34, %v1511_v37 }
 0x474   :  { %1542 = vst [vmem:[#allocation2 + $0x30] sm:$0xff] %v1534_v39 }
 0x476   :  { %v1652_v14 = vpop.eup %1651 }
 0x477   :  { %v1514_v44 = vmul.f32 %v1652_v14, %v1407_v38  ;;  %vm1519_vm10 = vweird.f32 %v1652_v14 }
 0x478   :  { %vm1520_vm13 = vmor %vm1518_vm12, %vm1519_vm10 }
 0x479   :  { %v1515_v35 = vsub.f32 1.0, %v1514_v44 }
 0x47b   :  { %v1516_v23 = vmul.f32 %v1652_v14, %v1515_v35 }
 0x47d   :  { %v1517_v29 = vadd.f32 %v1652_v14, %v1516_v23 }
 0x47f   :  { %v1521_v2 = vsel %vm1520_vm13, %v1652_v14, %v1517_v29 }
 0x480   :  { %v1526_v17 = vsel %vm1523_vm15, %v1525_v10, %v1521_v2 }
 0x481   :  { %v1535_v11 = vsel %vm1375_vm14, %v1373_v61, %v1526_v17 }
 0x482   :  { %1543 = vst [vmem:[#allocation2 + $0x38] sm:$0xff] %v1535_v11 }
 0x483   :  { %1556 = dma.vmem_to_hbm [thread:$0]  %s1549_s13, 1024, %s1551_s15, [#allocation3], %s1682_s16, %s1682_s16, %s1683_s17  }
 0x484   :  { %1677 = dma.done.wait [#allocation3], 1024  }
 0x485   :  { %1678 = vsyncadd [#allocation3], 4294966272 }
 0x486   :  { %1561 = vsyncpa [#allocation3], 1 }

</bundles_post_ra>
